<compile_context>
chip_gen: v7x
topology: tpu7x:2x2x1
jax: 0.10.0
libtpu: 0.0.40
codegen_flags: <defaults>
</compile_context>

<pallas_src>
import functools

import jax
import jax.numpy as jnp
import numpy as np
from jax import lax
from jax.experimental import pallas as pl
from jax.experimental.pallas import tpu as pltpu

EXPANSION = 4
BN_EPS = 1e-5
_VMEM_LIMIT = 48 * 1024 * 1024  # fits v5e/v6e/v7x physical VMEM, above default scoped limits


def _round_up(x, m):
    return (x + m - 1) // m * m


def _choose_tm(m):
    """Row tile for the (M, K) @ (K, N) kernels.

    Prefer large tiles (512 rows) but keep >= 2 grid steps whenever M allows so the
    "parallel" M axis can shard across v7x's two TensorCores. Never fall back to
    tm == M for large M (the caller pads M up to a multiple of tm instead).
    """
    for tm in (512, 256, 128):
        if m >= 2 * tm:
            return tm
    return min(_round_up(m, 8), 128)


def _cparams(num_axes):
    return pltpu.CompilerParams(
        dimension_semantics=("parallel",) * num_axes,
        vmem_limit_bytes=_VMEM_LIMIT,
    )


# ---------------------------------------------------------------------------
# Pallas kernels
# ---------------------------------------------------------------------------
def _mm_bias_act_kernel(a_ref, w_ref, b_ref, o_ref, *, relu):
    # out = act(a @ w + b)   (scale already folded into w)
    y = jnp.dot(a_ref[...], w_ref[...], preferred_element_type=jnp.float32)
    y = y + b_ref[...]
    if relu:
        y = jnp.maximum(y, 0.0)
    o_ref[...] = y.astype(o_ref.dtype)


def _mm_bias_res_relu_kernel(a_ref, w_ref, b_ref, r_ref, o_ref):
    # out = relu(a @ w + b + residual)   (identity shortcut)
    y = jnp.dot(a_ref[...], w_ref[...], preferred_element_type=jnp.float32)
    y = y + b_ref[...] + r_ref[...].astype(jnp.float32)
    o_ref[...] = jnp.maximum(y, 0.0).astype(o_ref.dtype)


def _mm_dual_bias_relu_kernel(a_ref, w_ref, a2_ref, w2_ref, b_ref, o_ref):
    # out = relu(a @ w + a2 @ w2 + b)   (stage-3 conv + projection shortcut fused)
    y = jnp.dot(a_ref[...], w_ref[...], preferred_element_type=jnp.float32)
    y = y + jnp.dot(a2_ref[...], w2_ref[...], preferred_element_type=jnp.float32)
    y = y + b_ref[...]
    o_ref[...] = jnp.maximum(y, 0.0).astype(o_ref.dtype)


def _conv3x3_kernel(x_ref, w_ref, b_ref, o_ref, *, stride, ho, wo):
    # Direct 3x3 conv, one batch image per grid step.
    #   x_ref: (1, stride*stride, hq, wq, C)  phase-decomposed padded activation (bf16)
    #   w_ref: (9, C, Cout)                   scale-folded taps, tap-major (kh*3 + kw) (bf16)
    #   b_ref: (1, Cout) f32;   o_ref: (1, ho, wo, Cout)
    c = x_ref.shape[-1]
    cout = w_ref.shape[-1]
    acc = jnp.zeros((ho * wo, cout), jnp.float32)
    for di in range(3):
        for dj in range(3):
            p = (di % stride) * stride + (dj % stride)  # which phase slab
            r0 = di // stride                           # static row offset inside the phase
            c0 = dj // stride                           # static col offset inside the phase
            patch = x_ref[0, p, r0:r0 + ho, c0:c0 + wo, :]          # (ho, wo, C)
            acc = acc + jnp.dot(
                patch.reshape(ho * wo, c), w_ref[di * 3 + dj],
                preferred_element_type=jnp.float32)
    y = jnp.maximum(acc + b_ref[...], 0.0)
    o_ref[...] = y.reshape(1, ho, wo, cout).astype(o_ref.dtype)


# ---------------------------------------------------------------------------
# pallas_call wrappers
# ---------------------------------------------------------------------------
def fused_matmul_bias_act(a, w, bias, *, relu, out_dtype):
    m, k = a.shape
    n = w.shape[1]
    tm = _choose_tm(m)
    mp = _round_up(m, tm)
    if mp != m:
        a = jnp.pad(a, ((0, mp - m), (0, 0)))
    out = pl.pallas_call(
        functools.partial(_mm_bias_act_kernel, relu=relu),
        out_shape=jax.ShapeDtypeStruct((mp, n), out_dtype),
        grid_spec=pltpu.PrefetchScalarGridSpec(
            num_scalar_prefetch=0,
            grid=(mp // tm,),
            in_specs=[
                pl.BlockSpec((tm, k), lambda i: (i, 0)),
                pl.BlockSpec((k, n), lambda i: (0, 0)),
                pl.BlockSpec((1, n), lambda i: (0, 0)),
            ],
            out_specs=pl.BlockSpec((tm, n), lambda i: (i, 0)),
        ),
        compiler_params=_cparams(1),
    )(a, w, bias)
    return out[:m] if mp != m else out


def fused_matmul_bias_res_relu(a, w, bias, res, *, out_dtype):
    m, k = a.shape
    n = w.shape[1]
    tm = _choose_tm(m)
    mp = _round_up(m, tm)
    if mp != m:
        a = jnp.pad(a, ((0, mp - m), (0, 0)))
        res = jnp.pad(res, ((0, mp - m), (0, 0)))
    out = pl.pallas_call(
        _mm_bias_res_relu_kernel,
        out_shape=jax.ShapeDtypeStruct((mp, n), out_dtype),
        grid_spec=pltpu.PrefetchScalarGridSpec(
            num_scalar_prefetch=0,
            grid=(mp // tm,),
            in_specs=[
                pl.BlockSpec((tm, k), lambda i: (i, 0)),
                pl.BlockSpec((k, n), lambda i: (0, 0)),
                pl.BlockSpec((1, n), lambda i: (0, 0)),
                pl.BlockSpec((tm, n), lambda i: (i, 0)),
            ],
            out_specs=pl.BlockSpec((tm, n), lambda i: (i, 0)),
        ),
        compiler_params=_cparams(1),
    )(a, w, bias, res)
    return out[:m] if mp != m else out


def fused_dual_matmul_bias_relu(a, w, a2, w2, bias, *, out_dtype):
    m, k1 = a.shape
    k2 = a2.shape[1]
    n = w.shape[1]
    tm = _choose_tm(m)
    mp = _round_up(m, tm)
    if mp != m:
        a = jnp.pad(a, ((0, mp - m), (0, 0)))
        a2 = jnp.pad(a2, ((0, mp - m), (0, 0)))
    out = pl.pallas_call(
        _mm_dual_bias_relu_kernel,
        out_shape=jax.ShapeDtypeStruct((mp, n), out_dtype),
        grid_spec=pltpu.PrefetchScalarGridSpec(
            num_scalar_prefetch=0,
            grid=(mp // tm,),
            in_specs=[
                pl.BlockSpec((tm, k1), lambda i: (i, 0)),
                pl.BlockSpec((k1, n), lambda i: (0, 0)),
                pl.BlockSpec((tm, k2), lambda i: (i, 0)),
                pl.BlockSpec((k2, n), lambda i: (0, 0)),
                pl.BlockSpec((1, n), lambda i: (0, 0)),
            ],
            out_specs=pl.BlockSpec((tm, n), lambda i: (i, 0)),
        ),
        compiler_params=_cparams(1),
    )(a, w, a2, w2, bias)
    return out[:m] if mp != m else out


def conv3x3_bias_relu(x, w_taps, bias, *, stride, out_dtype):
    """Direct 3x3 conv (pad=1, stride=s) + folded-BN bias + ReLU.

    x:      (N, H, W, C) bf16 activation
    w_taps: (9, C, Cout) bf16 scale-folded weights, tap-major (kh*3 + kw)
    bias:   (1, Cout) f32
    """
    n, h, w_sp, c = x.shape
    cout = w_taps.shape[-1]
    s = stride
    ho = (h - 1) // s + 1
    wo = (w_sp - 1) // s + 1
    off = 2 // s                       # max intra-phase tap offset (s=1 -> 2, s=2 -> 1)
    hq, wq = ho + off, wo + off
    hp = max(h + 2, s * hq)            # pad so every phase slab has >= hq rows / wq cols
    wp = max(w_sp + 2, s * wq)
    xp = jnp.pad(x, ((0, 0), (1, hp - h - 1), (1, wp - w_sp - 1), (0, 0)))
    # stride^2 phase slabs: total bytes ~= the padded input (NOT a 9x im2col tensor).
    phases = [xp[:, pe::s, pf::s, :][:, :hq, :wq, :]
              for pe in range(s) for pf in range(s)]
    xph = jnp.stack(phases, axis=1)    # (N, s*s, hq, wq, C)

    return pl.pallas_call(
        functools.partial(_conv3x3_kernel, stride=s, ho=ho, wo=wo),
        out_shape=jax.ShapeDtypeStruct((n, ho, wo, cout), out_dtype),
        grid_spec=pltpu.PrefetchScalarGridSpec(
            num_scalar_prefetch=0,
            grid=(n,),
            in_specs=[
                pl.BlockSpec((1, s * s, hq, wq, c), lambda i: (i, 0, 0, 0, 0)),
                pl.BlockSpec((9, c, cout), lambda i: (0, 0, 0)),
                pl.BlockSpec((1, cout), lambda i: (0, 0)),
            ],
            out_specs=pl.BlockSpec((1, ho, wo, cout), lambda i: (i, 0, 0, 0)),
        ),
        compiler_params=_cparams(1),
    )(xph, w_taps, bias)


# ---------------------------------------------------------------------------
# Parameter construction / BN folding (deterministic, shapes from Bottleneck.__init__)
# ---------------------------------------------------------------------------
def init_params(key, in_planes, planes, stride):
    cout = EXPANSION * planes
    keys = jax.random.split(key, 20)
    ki = iter(range(20))

    def conv_w(k, co, ci, kh, kw):
        return 0.1 * jax.random.normal(k, (co, ci, kh, kw), jnp.float32)

    def bn_p(k0, k1, k2, k3, c):
        gamma = jax.random.uniform(k0, (c,), jnp.float32, 0.5, 1.5)
        beta = 0.1 * jax.random.normal(k1, (c,), jnp.float32)
        mean = 0.1 * jax.random.normal(k2, (c,), jnp.float32)
        var = jax.random.uniform(k3, (c,), jnp.float32, 0.5, 1.5)
        return (gamma, beta, mean, var)

    p = {}
    p["w1"] = conv_w(keys[next(ki)], planes, in_planes, 1, 1)
    p["bn1"] = bn_p(keys[next(ki)], keys[next(ki)], keys[next(ki)], keys[next(ki)], planes)
    p["w2"] = conv_w(keys[next(ki)], planes, planes, 3, 3)
    p["bn2"] = bn_p(keys[next(ki)], keys[next(ki)], keys[next(ki)], keys[next(ki)], planes)
    p["w3"] = conv_w(keys[next(ki)], cout, planes, 1, 1)
    p["bn3"] = bn_p(keys[next(ki)], keys[next(ki)], keys[next(ki)], keys[next(ki)], cout)
    if stride != 1 or in_planes != cout:
        p["wsc"] = conv_w(keys[next(ki)], cout, in_planes, 1, 1)
        p["bnsc"] = bn_p(keys[next(ki)], keys[next(ki)], keys[next(ki)], keys[next(ki)], cout)
    return p


def fold_params(p):
    """Fold BN (inference/running-stats) scale into the conv weights.

    Weights become bf16 MXU operands; biases stay f32 for the epilogue.
    """
    def fold(gamma, beta, mean, var):
        s = gamma / jnp.sqrt(var + BN_EPS)
        return s, beta - mean * s

    s1, b1 = fold(*p["bn1"])
    s2, b2 = fold(*p["bn2"])
    s3, b3 = fold(*p["bn3"])
    fp = {}
    fp["w1"] = (jnp.transpose(p["w1"][:, :, 0, 0]) * s1[None, :]).astype(jnp.bfloat16)   # (cin, planes)
    fp["b1"] = b1.reshape(1, -1)
    w2 = jnp.transpose(p["w2"], (2, 3, 1, 0)) * s2[None, None, None, :]                   # (3,3,ci,co)
    fp["w2"] = w2.reshape(9, w2.shape[2], w2.shape[3]).astype(jnp.bfloat16)               # (9, ci, co)
    fp["b2"] = b2.reshape(1, -1)
    fp["w3"] = (jnp.transpose(p["w3"][:, :, 0, 0]) * s3[None, :]).astype(jnp.bfloat16)    # (planes, cout)
    fp["b3"] = b3.reshape(1, -1)
    if "wsc" in p:
        ssc, bsc = fold(*p["bnsc"])
        fp["wsc"] = (jnp.transpose(p["wsc"][:, :, 0, 0]) * ssc[None, :]).astype(jnp.bfloat16)
        fp["bsc"] = bsc.reshape(1, -1)
    return fp


# ---------------------------------------------------------------------------
# Bottleneck forward (Pallas)
# ---------------------------------------------------------------------------
def bottleneck_pallas(x_nchw, fp, *, stride, planes):
    cout = EXPANSION * planes
    x = jnp.transpose(x_nchw, (0, 2, 3, 1)).astype(jnp.float32)   # NCHW -> NHWC (boundary only)
    n, h, w_sp, cin = x.shape
    x_bf = x.astype(jnp.bfloat16)

    # stage 1: 1x1 conv (folded BN) + ReLU
    o1 = fused_matmul_bias_act(x_bf.reshape(n * h * w_sp, cin), fp["w1"], fp["b1"],
                               relu=True, out_dtype=jnp.bfloat16)
    o1 = o1.reshape(n, h, w_sp, planes)

    # stage 2: 3x3 conv, stride, pad=1 (folded BN) + ReLU  -- direct, no im2col round-trip
    o2 = conv3x3_bias_relu(o1, fp["w2"], fp["b2"], stride=stride, out_dtype=jnp.bfloat16)
    _, ho, wo, _ = o2.shape
    m = n * ho * wo
    o2 = o2.reshape(m, planes)

    # stage 3: 1x1 conv (folded BN) + residual + ReLU, shortcut fused into the same kernel
    if "wsc" in fp:
        xs = x_bf[:, ::stride, ::stride, :].reshape(m, cin)
        out = fused_dual_matmul_bias_relu(o2, fp["w3"], xs, fp["wsc"],
                                          fp["b3"] + fp["bsc"], out_dtype=jnp.float32)
    else:
        res = x.reshape(m, cout)                       # identity shortcut (stride 1, cin == cout)
        out = fused_matmul_bias_res_relu(o2, fp["w3"], fp["b3"], res, out_dtype=jnp.float32)

    out = out.reshape(n, ho, wo, cout)
    return jnp.transpose(out, (0, 3, 1, 2))            # back to NCHW at the boundary


# ---------------------------------------------------------------------------
# Reference (same numerical contract: folded BN, bf16 conv operands, f32 accumulate)
# ---------------------------------------------------------------------------
def bottleneck_ref(x_nchw, fp, stride, planes):
    cout = EXPANSION * planes
    x_f32 = jnp.transpose(x_nchw, (0, 2, 3, 1)).astype(jnp.float32)
    x = x_f32.astype(jnp.bfloat16)
    cin = x.shape[-1]

    def conv(xx, w_hwio, st, pad):
        return lax.conv_general_dilated(
            xx, w_hwio, (st, st), pad,
            dimension_numbers=("NHWC", "HWIO", "NHWC"),
            preferred_element_type=jnp.float32)

    w1 = fp["w1"].reshape(1, 1, cin, planes)
    w2 = fp["w2"].reshape(3, 3, planes, planes)
    w3 = fp["w3"].reshape(1, 1, planes, cout)

    o = jax.nn.relu(conv(x, w1, 1, "VALID") + fp["b1"]).astype(jnp.bfloat16)
    o = jax.nn.relu(conv(o, w2, stride, [(1, 1), (1, 1)]) + fp["b2"]).astype(jnp.bfloat16)
    o = conv(o, w3, 1, "VALID") + fp["b3"]
    if "wsc" in fp:
        wsc = fp["wsc"].reshape(1, 1, cin, cout)
        sc = conv(x, wsc, stride, "VALID") + fp["bsc"]
    else:
        sc = x_f32
    out = jax.nn.relu(o + sc)
    return jnp.transpose(out, (0, 3, 1, 2))


if __name__ == "__main__":
    configs = [
        # (batch, in_planes, planes, spatial, stride)
        (2, 16, 8, 16, 2),   # projection-shortcut path (stride 2)
        (2, 32, 8, 8, 1),    # identity-shortcut path
    ]
    for (batch, in_planes, planes, hw, stride) in configs:
        key = jax.random.PRNGKey(0)
        k_x, k_p = jax.random.split(key)
        x = jax.random.normal(k_x, (batch, in_planes, hw, hw), jnp.float32)   # NCHW
        params = init_params(k_p, in_planes, planes, stride)
        fp = fold_params(params)

        fwd = jax.jit(functools.partial(bottleneck_pallas, stride=stride, planes=planes))
        out = jax.block_until_ready(fwd(x, fp))

        ref = jax.block_until_ready(bottleneck_ref(x, fp, stride, planes))
        ho = (hw - 1) // stride + 1
        assert out.shape == (batch, EXPANSION * planes, ho, ho), out.shape
        # bf16 MXU operands / f32 accumulation in both paths -> agreement well inside 1e-2.
        np.testing.assert_allclose(np.asarray(out), np.asarray(ref), rtol=1e-2, atol=1e-2)

    print("KERNEL_OK")
</pallas_src>

<mosaic_0001>
module attributes {stable_mosaic.version = 11 : i64} {
  func.func @_mm_bias_act_kernel(%arg0: i32, %arg1: memref<256x16xbf16, #tpu.memory_space<vmem>>, %arg2: memref<16x8xbf16, #tpu.memory_space<vmem>>, %arg3: memref<1x8xf32, #tpu.memory_space<vmem>>, %arg4: memref<256x8xbf16, #tpu.memory_space<vmem>>) attributes {dimension_semantics = [#tpu.dimension_semantics<parallel>], iteration_bounds = array<i64: 2>, scalar_prefetch = 0 : i64, scratch_operands = 0 : i64, tpu.core_type = #tpu.core_type<tc>, window_params = [{transform_indices = @transform_0, window_bounds = array<i64: 256, 16>}, {pipeline_mode = #tpu.pipeline_mode<synchronous>, transform_indices = @transform_1, window_bounds = array<i64: 16, 8>}, {pipeline_mode = #tpu.pipeline_mode<synchronous>, transform_indices = @transform_2, window_bounds = array<i64: 1, 8>}, {transform_indices = @transform_3, window_bounds = array<i64: 256, 8>}]} {
    %c0 = arith.constant 0 : index
    %c0_0 = arith.constant 0 : index
    %0 = vector.load %arg1[%c0, %c0_0] : memref<256x16xbf16, #tpu.memory_space<vmem>>, vector<256x16xbf16>
    %c0_1 = arith.constant 0 : index
    %c0_2 = arith.constant 0 : index
    %1 = vector.load %arg2[%c0_1, %c0_2] : memref<16x8xbf16, #tpu.memory_space<vmem>>, vector<16x8xbf16>
    %cst = arith.constant dense<0.000000e+00> : vector<256x8xf32>
    %2 = tpu.matmul %0, %1, %cst {dimension_numbers = #tpu.dot_dimension_numbers<[1], [0], [0], [1], [0, 0, 1, 1], [], []>} : vector<256x16xbf16>, vector<16x8xbf16>, vector<256x8xf32> -> vector<256x8xf32>
    %c0_3 = arith.constant 0 : index
    %c0_4 = arith.constant 0 : index
    %3 = vector.load %arg3[%c0_3, %c0_4] : memref<1x8xf32, #tpu.memory_space<vmem>>, vector<1x8xf32>
    %4 = vector.broadcast %3 : vector<1x8xf32> to vector<256x8xf32>
    %5 = arith.addf %2, %4 : vector<256x8xf32>
    %cst_5 = arith.constant 0.000000e+00 : f32
    %6 = vector.broadcast %cst_5 : f32 to vector<256x8xf32>
    %7 = arith.maximumf %5, %6 : vector<256x8xf32>
    %8 = arith.truncf %7 : vector<256x8xf32> to vector<256x8xbf16>
    %c0_6 = arith.constant 0 : index
    %c0_7 = arith.constant 0 : index
    %9 = vector.load %arg4[%c0_6, %c0_7] : memref<256x8xbf16, #tpu.memory_space<vmem>>, vector<256x8xbf16>
    tpu.vector_store %arg4[%c0_6, %c0_7], %8 {strides = array<i32>} : memref<256x8xbf16, #tpu.memory_space<vmem>>, vector<256x8xbf16>,
    return
  }
  func.func @transform_0(%arg0: i32) -> (i32, i32) {
    %c0_i32 = arith.constant 0 : i32
    %c0_i32_0 = arith.constant 0 : i32
    return %arg0, %c0_i32 : i32, i32
  }
  func.func @transform_1(%arg0: i32) -> (i32, i32) {
    %c0_i32 = arith.constant 0 : i32
    %c0_i32_0 = arith.constant 0 : i32
    %c0_i32_1 = arith.constant 0 : i32
    return %c0_i32, %c0_i32_0 : i32, i32
  }
  func.func @transform_2(%arg0: i32) -> (i32, i32) {
    %c0_i32 = arith.constant 0 : i32
    %c0_i32_0 = arith.constant 0 : i32
    %c0_i32_1 = arith.constant 0 : i32
    return %c0_i32, %c0_i32_0 : i32, i32
  }
  func.func @transform_3(%arg0: i32) -> (i32, i32) {
    %c0_i32 = arith.constant 0 : i32
    %c0_i32_0 = arith.constant 0 : i32
    return %arg0, %c0_i32 : i32, i32
  }
}

module attributes {stable_mosaic.version = 11 : i64} {
  func.func @_mm_dual_bias_relu_kernel(%arg0: i32, %arg1: memref<128x8xbf16, #tpu.memory_space<vmem>>, %arg2: memref<8x32xbf16, #tpu.memory_space<vmem>>, %arg3: memref<128x16xbf16, #tpu.memory_space<vmem>>, %arg4: memref<16x32xbf16, #tpu.memory_space<vmem>>, %arg5: memref<1x32xf32, #tpu.memory_space<vmem>>, %arg6: memref<128x32xf32, #tpu.memory_space<vmem>>) attributes {dimension_semantics = [#tpu.dimension_semantics<parallel>], iteration_bounds = array<i64: 1>, scalar_prefetch = 0 : i64, scratch_operands = 0 : i64, tpu.core_type = #tpu.core_type<tc>, window_params = [{transform_indices = @transform_0, window_bounds = array<i64: 128, 8>}, {pipeline_mode = #tpu.pipeline_mode<synchronous>, transform_indices = @transform_1, window_bounds = array<i64: 8, 32>}, {transform_indices = @transform_2, window_bounds = array<i64: 128, 16>}, {pipeline_mode = #tpu.pipeline_mode<synchronous>, transform_indices = @transform_3, window_bounds = array<i64: 16, 32>}, {pipeline_mode = #tpu.pipeline_mode<synchronous>, transform_indices = @transform_4, window_bounds = array<i64: 1, 32>}, {transform_indices = @transform_5, window_bounds = array<i64: 128, 32>}]} {
    %c0 = arith.constant 0 : index
    %c0_0 = arith.constant 0 : index
    %0 = vector.load %arg1[%c0, %c0_0] : memref<128x8xbf16, #tpu.memory_space<vmem>>, vector<128x8xbf16>
    %c0_1 = arith.constant 0 : index
    %c0_2 = arith.constant 0 : index
    %1 = vector.load %arg2[%c0_1, %c0_2] : memref<8x32xbf16, #tpu.memory_space<vmem>>, vector<8x32xbf16>
    %cst = arith.constant dense<0.000000e+00> : vector<128x32xf32>
    %2 = tpu.matmul %0, %1, %cst {dimension_numbers = #tpu.dot_dimension_numbers<[1], [0], [0], [1], [0, 0, 1, 1], [], []>} : vector<128x8xbf16>, vector<8x32xbf16>, vector<128x32xf32> -> vector<128x32xf32>
    %c0_3 = arith.constant 0 : index
    %c0_4 = arith.constant 0 : index
    %3 = vector.load %arg3[%c0_3, %c0_4] : memref<128x16xbf16, #tpu.memory_space<vmem>>, vector<128x16xbf16>
    %c0_5 = arith.constant 0 : index
    %c0_6 = arith.constant 0 : index
    %4 = vector.load %arg4[%c0_5, %c0_6] : memref<16x32xbf16, #tpu.memory_space<vmem>>, vector<16x32xbf16>
    %cst_7 = arith.constant dense<0.000000e+00> : vector<128x32xf32>
    %5 = tpu.matmul %3, %4, %cst_7 {dimension_numbers = #tpu.dot_dimension_numbers<[1], [0], [0], [1], [0, 0, 1, 1], [], []>} : vector<128x16xbf16>, vector<16x32xbf16>, vector<128x32xf32> -> vector<128x32xf32>
    %6 = arith.addf %2, %5 : vector<128x32xf32>
    %c0_8 = arith.constant 0 : index
    %c0_9 = arith.constant 0 : index
    %7 = vector.load %arg5[%c0_8, %c0_9] : memref<1x32xf32, #tpu.memory_space<vmem>>, vector<1x32xf32>
    %8 = vector.broadcast %7 : vector<1x32xf32> to vector<128x32xf32>
    %9 = arith.addf %6, %8 : vector<128x32xf32>
    %cst_10 = arith.constant 0.000000e+00 : f32
    %10 = vector.broadcast %cst_10 : f32 to vector<128x32xf32>
    %11 = arith.maximumf %9, %10 : vector<128x32xf32>
    %c0_11 = arith.constant 0 : index
    %c0_12 = arith.constant 0 : index
    %12 = vector.load %arg6[%c0_11, %c0_12] : memref<128x32xf32, #tpu.memory_space<vmem>>, vector<128x32xf32>
    tpu.vector_store %arg6[%c0_11, %c0_12], %11 {strides = array<i32>} : memref<128x32xf32, #tpu.memory_space<vmem>>, vector<128x32xf32>,
    return
  }
  func.func @transform_0(%arg0: i32) -> (i32, i32) {
    %c0_i32 = arith.constant 0 : i32
    %c0_i32_0 = arith.constant 0 : i32
    return %arg0, %c0_i32 : i32, i32
  }
  func.func @transform_1(%arg0: i32) -> (i32, i32) {
    %c0_i32 = arith.constant 0 : i32
    %c0_i32_0 = arith.constant 0 : i32
    %c0_i32_1 = arith.constant 0 : i32
    return %c0_i32, %c0_i32_0 : i32, i32
  }
  func.func @transform_2(%arg0: i32) -> (i32, i32) {
    %c0_i32 = arith.constant 0 : i32
    %c0_i32_0 = arith.constant 0 : i32
    return %arg0, %c0_i32 : i32, i32
  }
  func.func @transform_3(%arg0: i32) -> (i32, i32) {
    %c0_i32 = arith.constant 0 : i32
    %c0_i32_0 = arith.constant 0 : i32
    %c0_i32_1 = arith.constant 0 : i32
    return %c0_i32, %c0_i32_0 : i32, i32
  }
  func.func @transform_4(%arg0: i32) -> (i32, i32) {
    %c0_i32 = arith.constant 0 : i32
    %c0_i32_0 = arith.constant 0 : i32
    %c0_i32_1 = arith.constant 0 : i32
    return %c0_i32, %c0_i32_0 : i32, i32
  }
  func.func @transform_5(%arg0: i32) -> (i32, i32) {
    %c0_i32 = arith.constant 0 : i32
    %c0_i32_0 = arith.constant 0 : i32
    return %arg0, %c0_i32 : i32, i32
  }
}

module attributes {stable_mosaic.version = 11 : i64} {
  func.func @_conv3x3_kernel(%arg0: i32, %arg1: memref<1x4x9x9x8xbf16, #tpu.memory_space<vmem>>, %arg2: memref<9x8x8xbf16, #tpu.memory_space<vmem>>, %arg3: memref<1x8xf32, #tpu.memory_space<vmem>>, %arg4: memref<1x8x8x8xbf16, #tpu.memory_space<vmem>>) attributes {dimension_semantics = [#tpu.dimension_semantics<parallel>], iteration_bounds = array<i64: 2>, scalar_prefetch = 0 : i64, scratch_operands = 0 : i64, tpu.core_type = #tpu.core_type<tc>, window_params = [{transform_indices = @transform_0, window_bounds = array<i64: 1, 4, 9, 9, 8>}, {pipeline_mode = #tpu.pipeline_mode<synchronous>, transform_indices = @transform_1, window_bounds = array<i64: 9, 8, 8>}, {pipeline_mode = #tpu.pipeline_mode<synchronous>, transform_indices = @transform_2, window_bounds = array<i64: 1, 8>}, {transform_indices = @transform_3, window_bounds = array<i64: 1, 8, 8, 8>}]} {
    %cst = arith.constant 0.000000e+00 : f32
    %0 = vector.broadcast %cst : f32 to vector<64x8xf32>
    %c0 = arith.constant 0 : index
    %c0_0 = arith.constant 0 : index
    %c0_1 = arith.constant 0 : index
    %c0_2 = arith.constant 0 : index
    %c0_3 = arith.constant 0 : index
    %1 = vector.load %arg1[%c0, %c0_0, %c0_1, %c0_2, %c0_3] : memref<1x4x9x9x8xbf16, #tpu.memory_space<vmem>>, vector<1x1x8x8x8xbf16>
    %2 = vector.shape_cast %1 : vector<1x1x8x8x8xbf16> to vector<8x8x8xbf16>
    %3 = vector.shape_cast %2 : vector<8x8x8xbf16> to vector<64x8xbf16>
    %c0_4 = arith.constant 0 : index
    %c0_5 = arith.constant 0 : index
    %c0_6 = arith.constant 0 : index
    %4 = vector.load %arg2[%c0_4, %c0_5, %c0_6] : memref<9x8x8xbf16, #tpu.memory_space<vmem>>, vector<1x8x8xbf16>
    %5 = vector.shape_cast %4 : vector<1x8x8xbf16> to vector<8x8xbf16>
    %cst_7 = arith.constant dense<0.000000e+00> : vector<64x8xf32>
    %6 = tpu.matmul %3, %5, %cst_7 {dimension_numbers = #tpu.dot_dimension_numbers<[1], [0], [0], [1], [0, 0, 1, 1], [], []>} : vector<64x8xbf16>, vector<8x8xbf16>, vector<64x8xf32> -> vector<64x8xf32>
    %7 = arith.addf %0, %6 : vector<64x8xf32>
    %c0_8 = arith.constant 0 : index
    %c1 = arith.constant 1 : index
    %c0_9 = arith.constant 0 : index
    %c0_10 = arith.constant 0 : index
    %c0_11 = arith.constant 0 : index
    %8 = vector.load %arg1[%c0_8, %c1, %c0_9, %c0_10, %c0_11] : memref<1x4x9x9x8xbf16, #tpu.memory_space<vmem>>, vector<1x1x8x8x8xbf16>
    %9 = vector.shape_cast %8 : vector<1x1x8x8x8xbf16> to vector<8x8x8xbf16>
    %10 = vector.shape_cast %9 : vector<8x8x8xbf16> to vector<64x8xbf16>
    %c1_12 = arith.constant 1 : index
    %c0_13 = arith.constant 0 : index
    %c0_14 = arith.constant 0 : index
    %11 = vector.load %arg2[%c1_12, %c0_13, %c0_14] : memref<9x8x8xbf16, #tpu.memory_space<vmem>>, vector<1x8x8xbf16>
    %12 = vector.shape_cast %11 : vector<1x8x8xbf16> to vector<8x8xbf16>
    %cst_15 = arith.constant dense<0.000000e+00> : vector<64x8xf32>
    %13 = tpu.matmul %10, %12, %cst_15 {dimension_numbers = #tpu.dot_dimension_numbers<[1], [0], [0], [1], [0, 0, 1, 1], [], []>} : vector<64x8xbf16>, vector<8x8xbf16>, vector<64x8xf32> -> vector<64x8xf32>
    %14 = arith.addf %7, %13 : vector<64x8xf32>
    %c0_16 = arith.constant 0 : index
    %c0_17 = arith.constant 0 : index
    %c0_18 = arith.constant 0 : index
    %c1_19 = arith.constant 1 : index
    %c0_20 = arith.constant 0 : index
    %15 = vector.load %arg1[%c0_16, %c0_17, %c0_18, %c1_19, %c0_20] : memref<1x4x9x9x8xbf16, #tpu.memory_space<vmem>>, vector<1x1x8x8x8xbf16>
    %16 = vector.shape_cast %15 : vector<1x1x8x8x8xbf16> to vector<8x8x8xbf16>
    %17 = vector.shape_cast %16 : vector<8x8x8xbf16> to vector<64x8xbf16>
    %c2 = arith.constant 2 : index
    %c0_21 = arith.constant 0 : index
    %c0_22 = arith.constant 0 : index
    %18 = vector.load %arg2[%c2, %c0_21, %c0_22] : memref<9x8x8xbf16, #tpu.memory_space<vmem>>, vector<1x8x8xbf16>
    %19 = vector.shape_cast %18 : vector<1x8x8xbf16> to vector<8x8xbf16>
    %cst_23 = arith.constant dense<0.000000e+00> : vector<64x8xf32>
    %20 = tpu.matmul %17, %19, %cst_23 {dimension_numbers = #tpu.dot_dimension_numbers<[1], [0], [0], [1], [0, 0, 1, 1], [], []>} : vector<64x8xbf16>, vector<8x8xbf16>, vector<64x8xf32> -> vector<64x8xf32>
    %21 = arith.addf %14, %20 : vector<64x8xf32>
    %c0_24 = arith.constant 0 : index
    %c2_25 = arith.constant 2 : index
    %c0_26 = arith.constant 0 : index
    %c0_27 = arith.constant 0 : index
    %c0_28 = arith.constant 0 : index
    %22 = vector.load %arg1[%c0_24, %c2_25, %c0_26, %c0_27, %c0_28] : memref<1x4x9x9x8xbf16, #tpu.memory_space<vmem>>, vector<1x1x8x8x8xbf16>
    %23 = vector.shape_cast %22 : vector<1x1x8x8x8xbf16> to vector<8x8x8xbf16>
    %24 = vector.shape_cast %23 : vector<8x8x8xbf16> to vector<64x8xbf16>
    %c3 = arith.constant 3 : index
    %c0_29 = arith.constant 0 : index
    %c0_30 = arith.constant 0 : index
    %25 = vector.load %arg2[%c3, %c0_29, %c0_30] : memref<9x8x8xbf16, #tpu.memory_space<vmem>>, vector<1x8x8xbf16>
    %26 = vector.shape_cast %25 : vector<1x8x8xbf16> to vector<8x8xbf16>
    %cst_31 = arith.constant dense<0.000000e+00> : vector<64x8xf32>
    %27 = tpu.matmul %24, %26, %cst_31 {dimension_numbers = #tpu.dot_dimension_numbers<[1], [0], [0], [1], [0, 0, 1, 1], [], []>} : vector<64x8xbf16>, vector<8x8xbf16>, vector<64x8xf32> -> vector<64x8xf32>
    %28 = arith.addf %21, %27 : vector<64x8xf32>
    %c0_32 = arith.constant 0 : index
    %c3_33 = arith.constant 3 : index
    %c0_34 = arith.constant 0 : index
    %c0_35 = arith.constant 0 : index
    %c0_36 = arith.constant 0 : index
    %29 = vector.load %arg1[%c0_32, %c3_33, %c0_34, %c0_35, %c0_36] : memref<1x4x9x9x8xbf16, #tpu.memory_space<vmem>>, vector<1x1x8x8x8xbf16>
    %30 = vector.shape_cast %29 : vector<1x1x8x8x8xbf16> to vector<8x8x8xbf16>
    %31 = vector.shape_cast %30 : vector<8x8x8xbf16> to vector<64x8xbf16>
    %c4 = arith.constant 4 : index
    %c0_37 = arith.constant 0 : index
    %c0_38 = arith.constant 0 : index
    %32 = vector.load %arg2[%c4, %c0_37, %c0_38] : memref<9x8x8xbf16, #tpu.memory_space<vmem>>, vector<1x8x8xbf16>
    %33 = vector.shape_cast %32 : vector<1x8x8xbf16> to vector<8x8xbf16>
    %cst_39 = arith.constant dense<0.000000e+00> : vector<64x8xf32>
    %34 = tpu.matmul %31, %33, %cst_39 {dimension_numbers = #tpu.dot_dimension_numbers<[1], [0], [0], [1], [0, 0, 1, 1], [], []>} : vector<64x8xbf16>, vector<8x8xbf16>, vector<64x8xf32> -> vector<64x8xf32>
    %35 = arith.addf %28, %34 : vector<64x8xf32>
    %c0_40 = arith.constant 0 : index
    %c2_41 = arith.constant 2 : index
    %c0_42 = arith.constant 0 : index
    %c1_43 = arith.constant 1 : index
    %c0_44 = arith.constant 0 : index
    %36 = vector.load %arg1[%c0_40, %c2_41, %c0_42, %c1_43, %c0_44] : memref<1x4x9x9x8xbf16, #tpu.memory_space<vmem>>, vector<1x1x8x8x8xbf16>
    %37 = vector.shape_cast %36 : vector<1x1x8x8x8xbf16> to vector<8x8x8xbf16>
    %38 = vector.shape_cast %37 : vector<8x8x8xbf16> to vector<64x8xbf16>
    %c5 = arith.constant 5 : index
    %c0_45 = arith.constant 0 : index
    %c0_46 = arith.constant 0 : index
    %39 = vector.load %arg2[%c5, %c0_45, %c0_46] : memref<9x8x8xbf16, #tpu.memory_space<vmem>>, vector<1x8x8xbf16>
    %40 = vector.shape_cast %39 : vector<1x8x8xbf16> to vector<8x8xbf16>
    %cst_47 = arith.constant dense<0.000000e+00> : vector<64x8xf32>
    %41 = tpu.matmul %38, %40, %cst_47 {dimension_numbers = #tpu.dot_dimension_numbers<[1], [0], [0], [1], [0, 0, 1, 1], [], []>} : vector<64x8xbf16>, vector<8x8xbf16>, vector<64x8xf32> -> vector<64x8xf32>
    %42 = arith.addf %35, %41 : vector<64x8xf32>
    %c0_48 = arith.constant 0 : index
    %c0_49 = arith.constant 0 : index
    %c1_50 = arith.constant 1 : index
    %c0_51 = arith.constant 0 : index
    %c0_52 = arith.constant 0 : index
    %43 = vector.load %arg1[%c0_48, %c0_49, %c1_50, %c0_51, %c0_52] : memref<1x4x9x9x8xbf16, #tpu.memory_space<vmem>>, vector<1x1x8x8x8xbf16>
    %44 = vector.shape_cast %43 : vector<1x1x8x8x8xbf16> to vector<8x8x8xbf16>
    %45 = vector.shape_cast %44 : vector<8x8x8xbf16> to vector<64x8xbf16>
    %c6 = arith.constant 6 : index
    %c0_53 = arith.constant 0 : index
    %c0_54 = arith.constant 0 : index
    %46 = vector.load %arg2[%c6, %c0_53, %c0_54] : memref<9x8x8xbf16, #tpu.memory_space<vmem>>, vector<1x8x8xbf16>
    %47 = vector.shape_cast %46 : vector<1x8x8xbf16> to vector<8x8xbf16>
    %cst_55 = arith.constant dense<0.000000e+00> : vector<64x8xf32>
    %48 = tpu.matmul %45, %47, %cst_55 {dimension_numbers = #tpu.dot_dimension_numbers<[1], [0], [0], [1], [0, 0, 1, 1], [], []>} : vector<64x8xbf16>, vector<8x8xbf16>, vector<64x8xf32> -> vector<64x8xf32>
    %49 = arith.addf %42, %48 : vector<64x8xf32>
    %c0_56 = arith.constant 0 : index
    %c1_57 = arith.constant 1 : index
    %c1_58 = arith.constant 1 : index
    %c0_59 = arith.constant 0 : index
    %c0_60 = arith.constant 0 : index
    %50 = vector.load %arg1[%c0_56, %c1_57, %c1_58, %c0_59, %c0_60] : memref<1x4x9x9x8xbf16, #tpu.memory_space<vmem>>, vector<1x1x8x8x8xbf16>
    %51 = vector.shape_cast %50 : vector<1x1x8x8x8xbf16> to vector<8x8x8xbf16>
    %52 = vector.shape_cast %51 : vector<8x8x8xbf16> to vector<64x8xbf16>
    %c7 = arith.constant 7 : index
    %c0_61 = arith.constant 0 : index
    %c0_62 = arith.constant 0 : index
    %53 = vector.load %arg2[%c7, %c0_61, %c0_62] : memref<9x8x8xbf16, #tpu.memory_space<vmem>>, vector<1x8x8xbf16>
    %54 = vector.shape_cast %53 : vector<1x8x8xbf16> to vector<8x8xbf16>
    %cst_63 = arith.constant dense<0.000000e+00> : vector<64x8xf32>
    %55 = tpu.matmul %52, %54, %cst_63 {dimension_numbers = #tpu.dot_dimension_numbers<[1], [0], [0], [1], [0, 0, 1, 1], [], []>} : vector<64x8xbf16>, vector<8x8xbf16>, vector<64x8xf32> -> vector<64x8xf32>
    %56 = arith.addf %49, %55 : vector<64x8xf32>
    %c0_64 = arith.constant 0 : index
    %c0_65 = arith.constant 0 : index
    %c1_66 = arith.constant 1 : index
    %c1_67 = arith.constant 1 : index
    %c0_68 = arith.constant 0 : index
    %57 = vector.load %arg1[%c0_64, %c0_65, %c1_66, %c1_67, %c0_68] : memref<1x4x9x9x8xbf16, #tpu.memory_space<vmem>>, vector<1x1x8x8x8xbf16>
    %58 = vector.shape_cast %57 : vector<1x1x8x8x8xbf16> to vector<8x8x8xbf16>
    %59 = vector.shape_cast %58 : vector<8x8x8xbf16> to vector<64x8xbf16>
    %c8 = arith.constant 8 : index
    %c0_69 = arith.constant 0 : index
    %c0_70 = arith.constant 0 : index
    %60 = vector.load %arg2[%c8, %c0_69, %c0_70] : memref<9x8x8xbf16, #tpu.memory_space<vmem>>, vector<1x8x8xbf16>
    %61 = vector.shape_cast %60 : vector<1x8x8xbf16> to vector<8x8xbf16>
    %cst_71 = arith.constant dense<0.000000e+00> : vector<64x8xf32>
    %62 = tpu.matmul %59, %61, %cst_71 {dimension_numbers = #tpu.dot_dimension_numbers<[1], [0], [0], [1], [0, 0, 1, 1], [], []>} : vector<64x8xbf16>, vector<8x8xbf16>, vector<64x8xf32> -> vector<64x8xf32>
    %63 = arith.addf %56, %62 : vector<64x8xf32>
    %c0_72 = arith.constant 0 : index
    %c0_73 = arith.constant 0 : index
    %64 = vector.load %arg3[%c0_72, %c0_73] : memref<1x8xf32, #tpu.memory_space<vmem>>, vector<1x8xf32>
    %65 = vector.broadcast %64 : vector<1x8xf32> to vector<64x8xf32>
    %66 = arith.addf %63, %65 : vector<64x8xf32>
    %cst_74 = arith.constant 0.000000e+00 : f32
    %67 = vector.broadcast %cst_74 : f32 to vector<64x8xf32>
    %68 = arith.maximumf %66, %67 : vector<64x8xf32>
    %69 = vector.shape_cast %68 : vector<64x8xf32> to vector<1x8x8x8xf32>
    %70 = arith.truncf %69 : vector<1x8x8x8xf32> to vector<1x8x8x8xbf16>
    %c0_75 = arith.constant 0 : index
    %c0_76 = arith.constant 0 : index
    %c0_77 = arith.constant 0 : index
    %c0_78 = arith.constant 0 : index
    %71 = vector.load %arg4[%c0_75, %c0_76, %c0_77, %c0_78] : memref<1x8x8x8xbf16, #tpu.memory_space<vmem>>, vector<1x8x8x8xbf16>
    tpu.vector_store %arg4[%c0_75, %c0_76, %c0_77, %c0_78], %70 {strides = array<i32>} : memref<1x8x8x8xbf16, #tpu.memory_space<vmem>>, vector<1x8x8x8xbf16>,
    return
  }
  func.func @transform_0(%arg0: i32) -> (i32, i32, i32, i32, i32) {
    %c0_i32 = arith.constant 0 : i32
    %c0_i32_0 = arith.constant 0 : i32
    %c0_i32_1 = arith.constant 0 : i32
    %c0_i32_2 = arith.constant 0 : i32
    %c0_i32_3 = arith.constant 0 : i32
    return %arg0, %c0_i32, %c0_i32_0, %c0_i32_1, %c0_i32_2 : i32, i32, i32, i32, i32
  }
  func.func @transform_1(%arg0: i32) -> (i32, i32, i32) {
    %c0_i32 = arith.constant 0 : i32
    %c0_i32_0 = arith.constant 0 : i32
    %c0_i32_1 = arith.constant 0 : i32
    %c0_i32_2 = arith.constant 0 : i32
    return %c0_i32, %c0_i32_0, %c0_i32_1 : i32, i32, i32
  }
  func.func @transform_2(%arg0: i32) -> (i32, i32) {
    %c0_i32 = arith.constant 0 : i32
    %c0_i32_0 = arith.constant 0 : i32
    %c0_i32_1 = arith.constant 0 : i32
    return %c0_i32, %c0_i32_0 : i32, i32
  }
  func.func @transform_3(%arg0: i32) -> (i32, i32, i32, i32) {
    %c0_i32 = arith.constant 0 : i32
    %c0_i32_0 = arith.constant 0 : i32
    %c0_i32_1 = arith.constant 0 : i32
    %c0_i32_2 = arith.constant 0 : i32
    return %arg0, %c0_i32, %c0_i32_0, %c0_i32_1 : i32, i32, i32, i32
  }
}

</mosaic_0001>

<bundles_post_ra>
// kernel: bottleneck_pallas.3
= control target key start
LH: loop header
LB: loop body
LE: loop exit
PB: predicated region body
PF: predicated region fallthrough
CT: control target
= control target key end

     0   :  { %s976_s12 = smov 0   ;;  %s1140_s0 = inlined_call_operand.vmem [shape: bf16[512,16], index: 0, kind: input, shape index: {}]   ;;  %s1141_s1 = inlined_call_operand.vmem [shape: bf16[16,8], index: 1, kind: input, shape index: {}]   ;;  %s1142_s2 = inlined_call_operand.vmem [shape: f32[1,8], index: 2, kind: input, shape index: {}]   ;;  %s1143_s3 = inlined_call_operand.vmem [shape: bf16[512,8], index: 3, kind: output, shape index: {}]  }
   0x1 LB: > { %s761_s13 = sadd.s32 4294967295, %s954_s12   ;;  %p765_p0 = scmp.ge.s32.totalorder %s954_s12, 1  ;;  %s954_s12 = sphi %s976_s12, %s13_s12  }
   0x2   : > { %p138_p1 = scmp.lt.s32.totalorder %s954_s12, 3 }
   0x4   : > { %p139_p2 = pnand %p765_p0, %p138_p1 }
   0x5   : > { %v931_v0 = vld [vmem:[%s1141_s1] sm:$0xff] (!%p139_p2)   ;;  %s766_s16 = sshll.u32 (!%p139_p2), %s761_s13, 5  ;;  %vm302_vm0 = vcmask (!%p139_p2), 130048   ;;  %vm672_vm1 = vcmask (!%p139_p2), 60416  }
   0x6   : > { %142 = sbr.rel (%p139_p2) target bundleno = 265 (0x109), region = 32  ;;  %p163_p3 = scmp.lt.s32.totalorder (!%p139_p2), %s766_s16, 63  ;;  %887 = vmatprep.subr.bf16.mxu0 (!%p139_p2), %v931_v0  ;;  %921 = vmatprep.subr.bf16.mxu1 (!%p139_p2), %v931_v0  ;;  %v1032_v17 = vld [vmem:[%s1142_s2] ss:$0 sm:$0xff] (!%p139_p2) }
   0x7   : > { %888 = vmatpush3.bf16.msra.mxu0 (!%p139_p2), %v931_v0  ;;  %922 = vmatpush3.bf16.msra.mxu1 (!%p139_p2), %v931_v0 }
   0xd   : > { %s1145_s16 = smov (!%p163_p3, %s766_s16), 63 }
   0xe   : > { %s767_s17 = sshll.u32 %s1145_s16, 2 }
   0xf   : > { %s995_s20 = scalar_lea.vmem %s1140_s0, %s767_s17  ;;  %s1044_s25 = scalar_lea.vmem %s1143_s3, %s767_s17 }
  0x10   : > { %v932_v1 = vld [vmem:[%s995_s20] sm:$0xff]   ;;  %v934_v3 = vld [vmem:[%s995_s20 + $0x8] sm:$0xff]   ;;  %v936_v5 = vld [vmem:[%s995_s20 + $0x10] sm:$0xff]  }
  0x11   : > { %v933_v2 = vld [vmem:[%s995_s20 + $0x40] sm:$0xff]   ;;  %889 = vmatprep.mubr.msk.bf16.mxu0 %vm302_vm0, %v932_v1  ;;  %v935_v4 = vld [vmem:[%s995_s20 + $0x48] sm:$0xff]   ;;  %v937_v6 = vld [vmem:[%s995_s20 + $0x50] sm:$0xff]  }
  0x12   : > { %905 = vmatprep.mubr.msk.bf16.mxu1 %vm302_vm0, %v933_v2  ;;  %890 = vmatmul.mubr.msk.bf16.vlgmr.msra.gmra.mrb[0].mxu0 %vm302_vm0, %v934_v3  ;;  %v938_v7 = vld [vmem:[%s995_s20 + $0x18] sm:$0xff]   ;;  %v940_v9 = vld [vmem:[%s995_s20 + $0x20] sm:$0xff]   ;;  %v942_v11 = vld [vmem:[%s995_s20 + $0x28] sm:$0xff]  }
  0x13   : > { %906 = vmatmul.mubr.msk.bf16.vlgmr.msra.gmra.mrb[0].mxu1 %vm302_vm0, %v935_v4  ;;  %893 = vmatprep.mubr.msk.bf16.mxu0 %vm302_vm0, %v936_v5  ;;  %v939_v8 = vld [vmem:[%s995_s20 + $0x58] sm:$0xff]   ;;  %v941_v10 = vld [vmem:[%s995_s20 + $0x60] sm:$0xff]   ;;  %v943_v12 = vld [vmem:[%s995_s20 + $0x68] sm:$0xff]  }
  0x14   : > { %909 = vmatprep.mubr.msk.bf16.mxu1 %vm302_vm0, %v937_v6  ;;  %v944_v13 = vld [vmem:[%s995_s20 + $0x30] sm:$0xff]   ;;  %v946_v15 = vld [vmem:[%s995_s20 + $0x38] sm:$0xff]  }
  0x15   : > { %v945_v14 = vld [vmem:[%s995_s20 + $0x70] sm:$0xff]   ;;  %v947_v16 = vld [vmem:[%s995_s20 + $0x78] sm:$0xff]  }
  0x1a   : > { %894 = vmatmul.mubr.msk.bf16.gmra.mrb[4].mxu0 %vm302_vm0, %v938_v7 }
  0x1b   : > { %910 = vmatmul.mubr.msk.bf16.gmra.mrb[4].mxu1 %vm302_vm0, %v939_v8  ;;  %897 = vmatprep.mubr.msk.bf16.mxu0 %vm302_vm0, %v940_v9 }
  0x1c   : > { %913 = vmatprep.mubr.msk.bf16.mxu1 %vm302_vm0, %v941_v10 }
  0x22   : > { %898 = vmatmul.mubr.msk.bf16.gmra.mrb[8].mxu0 %vm302_vm0, %v942_v11 }
  0x23   : > { %914 = vmatmul.mubr.msk.bf16.gmra.mrb[8].mxu1 %vm302_vm0, %v943_v12  ;;  %901 = vmatprep.mubr.msk.bf16.mxu0 %vm302_vm0, %v944_v13 }
  0x24   : > { %917 = vmatprep.mubr.msk.bf16.mxu1 %vm302_vm0, %v945_v14 }
  0x2a   : > { %902 = vmatmul.mubr.msk.bf16.gmra.mrb[12].mxu0 %vm302_vm0, %v946_v15 }
  0x2b   : > { %918 = vmatmul.mubr.msk.bf16.gmra.mrb[12].mxu1 %vm302_vm0, %v947_v16 }
  0xe5   : > { %v891_v18 = vpop.f32.mrb[0].mxu0 }
  0xe6   : > { %v394_v19 = vadd.f32 %v891_v18, %v1032_v17  ;;  %v907_v20 = vpop.f32.mrb[0].mxu1  ;;  %v385_v21 = vpop.f32.mrb[1].mxu0 }
  0xe7   : > { %v458_v22 = vadd.f32 %v907_v20, %v1032_v17  ;;  %v386_v23 = vadd.f32 %v1032_v17, %v385_v21  ;;  %v449_v24 = vpop.f32.mrb[1].mxu1  ;;  %v892_v25 = vpop.f32.mrb[2].mxu0 }
  0xe8   : > { %v514_v26 = vmax.f32 %v394_v19, 0.0  ;;  %v450_v27 = vadd.f32 %v1032_v17, %v449_v24  ;;  %v397_v28 = vadd.f32 %v892_v25, %v1032_v17  ;;  %v908_v29 = vpop.f32.mrb[2].mxu1  ;;  %v388_v30 = vpop.f32.mrb[3].mxu0 }
  0xe9   : > { %v530_v31 = vmax.f32 %v458_v22, 0.0  ;;  %v512_v32 = vmax.f32 %v386_v23, 0.0  ;;  %v461_v33 = vadd.f32 %v908_v29, %v1032_v17  ;;  %v389_v34 = vadd.f32 %v1032_v17, %v388_v30  ;;  %v452_v35 = vpop.f32.mrb[3].mxu1 }
  0xea   : > { %v840_v36 = vpack.c.bf16 %v514_v26, %v514_v26  ;;  %v528_v37 = vmax.f32 %v450_v27, 0.0  ;;  %v515_v38 = vmax.f32 %v397_v28, 0.0  ;;  %v453_v39 = vadd.f32 %v1032_v17, %v452_v35 }
  0xeb   : > { %v856_v40 = vpack.c.bf16 %v530_v31, %v530_v31  ;;  %v838_v41 = vpack.c.bf16 %v512_v32, %v512_v32  ;;  %v531_v42 = vmax.f32 %v461_v33, 0.0  ;;  %v513_v43 = vmax.f32 %v389_v34, 0.0 }
  0xec   : > { %675 = vst.msk [vmem:[%s1044_s25 + $0x8] sm:$0xf] %vm672_vm1, %v840_v36  ;;  %v854_v44 = vpack.c.bf16 %v528_v37, %v528_v37  ;;  %v841_v45 = vpack.c.bf16 %v515_v38, %v515_v38  ;;  %v529_v46 = vmax.f32 %v453_v39, 0.0 }
  0xed   : > { %691 = vst.msk [vmem:[%s1044_s25 + $0x48] sm:$0xf] %vm672_vm1, %v856_v40  ;;  %673 = vst.msk [vmem:[%s1044_s25] sm:$0xf] %vm672_vm1, %v838_v41  ;;  %v857_v47 = vpack.c.bf16 %v531_v42, %v531_v42  ;;  %v839_v48 = vpack.c.bf16 %v513_v43, %v513_v43  ;;  %v895_v49 = vpop.f32.mrb[4].mxu0 }
  0xee   : > { %689 = vst.msk [vmem:[%s1044_s25 + $0x40] sm:$0xf] %vm672_vm1, %v854_v44  ;;  %676 = vst.msk [vmem:[%s1044_s25 + $0xc] sm:$0xf] %vm672_vm1, %v841_v45  ;;  %v855_v50 = vpack.c.bf16 %v529_v46, %v529_v46  ;;  %v410_v51 = vadd.f32 %v895_v49, %v1032_v17  ;;  %v911_v52 = vpop.f32.mrb[4].mxu1  ;;  %v401_v53 = vpop.f32.mrb[5].mxu0 }
  0xef   : > { %692 = vst.msk [vmem:[%s1044_s25 + $0x4c] sm:$0xf] %vm672_vm1, %v857_v47  ;;  %674 = vst.msk [vmem:[%s1044_s25 + $0x4] sm:$0xf] %vm672_vm1, %v839_v48  ;;  %v474_v54 = vadd.f32 %v911_v52, %v1032_v17  ;;  %v402_v55 = vadd.f32 %v1032_v17, %v401_v53  ;;  %v465_v56 = vpop.f32.mrb[5].mxu1  ;;  %v896_v57 = vpop.f32.mrb[6].mxu0 }
  0xf0   : > { %690 = vst.msk [vmem:[%s1044_s25 + $0x44] sm:$0xf] %vm672_vm1, %v855_v50  ;;  %v518_v58 = vmax.f32 %v410_v51, 0.0  ;;  %v466_v59 = vadd.f32 %v1032_v17, %v465_v56  ;;  %v413_v60 = vadd.f32 %v896_v57, %v1032_v17  ;;  %v912_v61 = vpop.f32.mrb[6].mxu1  ;;  %v404_v62 = vpop.f32.mrb[7].mxu0 }
  0xf1   : > { %v534_v63 = vmax.f32 %v474_v54, 0.0  ;;  %v516_v0 = vmax.f32 %v402_v55, 0.0  ;;  %v477_v1 = vadd.f32 %v912_v61, %v1032_v17  ;;  %v405_v2 = vadd.f32 %v1032_v17, %v404_v62  ;;  %v468_v3 = vpop.f32.mrb[7].mxu1 }
  0xf2   : > { %v844_v4 = vpack.c.bf16 %v518_v58, %v518_v58  ;;  %v532_v5 = vmax.f32 %v466_v59, 0.0  ;;  %v519_v6 = vmax.f32 %v413_v60, 0.0  ;;  %v469_v7 = vadd.f32 %v1032_v17, %v468_v3 }
  0xf3   : > { %v860_v8 = vpack.c.bf16 %v534_v63, %v534_v63  ;;  %v842_v9 = vpack.c.bf16 %v516_v0, %v516_v0  ;;  %v535_v10 = vmax.f32 %v477_v1, 0.0  ;;  %v517_v11 = vmax.f32 %v405_v2, 0.0 }
  0xf4   : > { %679 = vst.msk [vmem:[%s1044_s25 + $0x18] sm:$0xf] %vm672_vm1, %v844_v4  ;;  %v858_v12 = vpack.c.bf16 %v532_v5, %v532_v5  ;;  %v845_v13 = vpack.c.bf16 %v519_v6, %v519_v6  ;;  %v533_v14 = vmax.f32 %v469_v7, 0.0 }
  0xf5   : > { %695 = vst.msk [vmem:[%s1044_s25 + $0x58] sm:$0xf] %vm672_vm1, %v860_v8  ;;  %677 = vst.msk [vmem:[%s1044_s25 + $0x10] sm:$0xf] %vm672_vm1, %v842_v9  ;;  %v861_v15 = vpack.c.bf16 %v535_v10, %v535_v10  ;;  %v843_v16 = vpack.c.bf16 %v517_v11, %v517_v11  ;;  %v899_v18 = vpop.f32.mrb[8].mxu0 }
  0xf6   : > { %693 = vst.msk [vmem:[%s1044_s25 + $0x50] sm:$0xf] %vm672_vm1, %v858_v12  ;;  %680 = vst.msk [vmem:[%s1044_s25 + $0x1c] sm:$0xf] %vm672_vm1, %v845_v13  ;;  %v859_v19 = vpack.c.bf16 %v533_v14, %v533_v14  ;;  %v426_v20 = vadd.f32 %v899_v18, %v1032_v17  ;;  %v915_v21 = vpop.f32.mrb[8].mxu1  ;;  %v417_v22 = vpop.f32.mrb[9].mxu0 }
  0xf7   : > { %696 = vst.msk [vmem:[%s1044_s25 + $0x5c] sm:$0xf] %vm672_vm1, %v861_v15  ;;  %678 = vst.msk [vmem:[%s1044_s25 + $0x14] sm:$0xf] %vm672_vm1, %v843_v16  ;;  %v490_v23 = vadd.f32 %v915_v21, %v1032_v17  ;;  %v418_v24 = vadd.f32 %v1032_v17, %v417_v22  ;;  %v481_v25 = vpop.f32.mrb[9].mxu1  ;;  %v900_v26 = vpop.f32.mrb[10].mxu0 }
  0xf8   : > { %694 = vst.msk [vmem:[%s1044_s25 + $0x54] sm:$0xf] %vm672_vm1, %v859_v19  ;;  %v522_v27 = vmax.f32 %v426_v20, 0.0  ;;  %v482_v28 = vadd.f32 %v1032_v17, %v481_v25  ;;  %v429_v29 = vadd.f32 %v900_v26, %v1032_v17  ;;  %v916_v30 = vpop.f32.mrb[10].mxu1  ;;  %v420_v31 = vpop.f32.mrb[11].mxu0 }
  0xf9   : > { %v538_v32 = vmax.f32 %v490_v23, 0.0  ;;  %v520_v33 = vmax.f32 %v418_v24, 0.0  ;;  %v493_v34 = vadd.f32 %v916_v30, %v1032_v17  ;;  %v421_v35 = vadd.f32 %v1032_v17, %v420_v31  ;;  %v484_v36 = vpop.f32.mrb[11].mxu1 }
  0xfa   : > { %v848_v37 = vpack.c.bf16 %v522_v27, %v522_v27  ;;  %v536_v38 = vmax.f32 %v482_v28, 0.0  ;;  %v523_v39 = vmax.f32 %v429_v29, 0.0  ;;  %v485_v40 = vadd.f32 %v1032_v17, %v484_v36 }
  0xfb   : > { %v864_v41 = vpack.c.bf16 %v538_v32, %v538_v32  ;;  %v846_v42 = vpack.c.bf16 %v520_v33, %v520_v33  ;;  %v539_v43 = vmax.f32 %v493_v34, 0.0  ;;  %v521_v44 = vmax.f32 %v421_v35, 0.0 }
  0xfc   : > { %683 = vst.msk [vmem:[%s1044_s25 + $0x28] sm:$0xf] %vm672_vm1, %v848_v37  ;;  %v862_v45 = vpack.c.bf16 %v536_v38, %v536_v38  ;;  %v849_v46 = vpack.c.bf16 %v523_v39, %v523_v39  ;;  %v537_v47 = vmax.f32 %v485_v40, 0.0 }
  0xfd   : > { %699 = vst.msk [vmem:[%s1044_s25 + $0x68] sm:$0xf] %vm672_vm1, %v864_v41  ;;  %681 = vst.msk [vmem:[%s1044_s25 + $0x20] sm:$0xf] %vm672_vm1, %v846_v42  ;;  %v865_v48 = vpack.c.bf16 %v539_v43, %v539_v43  ;;  %v847_v49 = vpack.c.bf16 %v521_v44, %v521_v44  ;;  %v903_v50 = vpop.f32.mrb[12].mxu0 }
  0xfe   : > { %697 = vst.msk [vmem:[%s1044_s25 + $0x60] sm:$0xf] %vm672_vm1, %v862_v45  ;;  %684 = vst.msk [vmem:[%s1044_s25 + $0x2c] sm:$0xf] %vm672_vm1, %v849_v46  ;;  %v863_v51 = vpack.c.bf16 %v537_v47, %v537_v47  ;;  %v442_v52 = vadd.f32 %v903_v50, %v1032_v17  ;;  %v919_v53 = vpop.f32.mrb[12].mxu1  ;;  %v433_v54 = vpop.f32.mrb[13].mxu0 }
  0xff   : > { %700 = vst.msk [vmem:[%s1044_s25 + $0x6c] sm:$0xf] %vm672_vm1, %v865_v48  ;;  %682 = vst.msk [vmem:[%s1044_s25 + $0x24] sm:$0xf] %vm672_vm1, %v847_v49  ;;  %v506_v55 = vadd.f32 %v919_v53, %v1032_v17  ;;  %v434_v56 = vadd.f32 %v1032_v17, %v433_v54  ;;  %v497_v57 = vpop.f32.mrb[13].mxu1  ;;  %v904_v58 = vpop.f32.mrb[14].mxu0 }
 0x100   : > { %698 = vst.msk [vmem:[%s1044_s25 + $0x64] sm:$0xf] %vm672_vm1, %v863_v51  ;;  %v526_v59 = vmax.f32 %v442_v52, 0.0  ;;  %v498_v60 = vadd.f32 %v1032_v17, %v497_v57  ;;  %v445_v61 = vadd.f32 %v904_v58, %v1032_v17  ;;  %v920_v62 = vpop.f32.mrb[14].mxu1  ;;  %v436_v63 = vpop.f32.mrb[15].mxu0 }
 0x101   : > { %v542_v0 = vmax.f32 %v506_v55, 0.0  ;;  %v524_v1 = vmax.f32 %v434_v56, 0.0  ;;  %v509_v2 = vadd.f32 %v920_v62, %v1032_v17  ;;  %v437_v3 = vadd.f32 %v1032_v17, %v436_v63  ;;  %v500_v4 = vpop.f32.mrb[15].mxu1 }
 0x102   : > { %v852_v5 = vpack.c.bf16 %v526_v59, %v526_v59  ;;  %v540_v6 = vmax.f32 %v498_v60, 0.0  ;;  %v527_v7 = vmax.f32 %v445_v61, 0.0  ;;  %v501_v8 = vadd.f32 %v1032_v17, %v500_v4 }
 0x103   : > { %v868_v9 = vpack.c.bf16 %v542_v0, %v542_v0  ;;  %v850_v10 = vpack.c.bf16 %v524_v1, %v524_v1  ;;  %v543_v11 = vmax.f32 %v509_v2, 0.0  ;;  %v525_v12 = vmax.f32 %v437_v3, 0.0 }
 0x104   : > { %687 = vst.msk [vmem:[%s1044_s25 + $0x38] sm:$0xf] %vm672_vm1, %v852_v5  ;;  %v866_v13 = vpack.c.bf16 %v540_v6, %v540_v6  ;;  %v853_v14 = vpack.c.bf16 %v527_v7, %v527_v7  ;;  %v541_v15 = vmax.f32 %v501_v8, 0.0 }
 0x105   : > { %703 = vst.msk [vmem:[%s1044_s25 + $0x78] sm:$0xf] %vm672_vm1, %v868_v9  ;;  %685 = vst.msk [vmem:[%s1044_s25 + $0x30] sm:$0xf] %vm672_vm1, %v850_v10  ;;  %v869_v16 = vpack.c.bf16 %v543_v11, %v543_v11  ;;  %v851_v18 = vpack.c.bf16 %v525_v12, %v525_v12 }
 0x106   : > { %701 = vst.msk [vmem:[%s1044_s25 + $0x70] sm:$0xf] %vm672_vm1, %v866_v13  ;;  %688 = vst.msk [vmem:[%s1044_s25 + $0x3c] sm:$0xf] %vm672_vm1, %v853_v14  ;;  %v867_v17 = vpack.c.bf16 %v541_v15, %v541_v15 }
 0x107   : > { %704 = vst.msk [vmem:[%s1044_s25 + $0x7c] sm:$0xf] %vm672_vm1, %v869_v16  ;;  %686 = vst.msk [vmem:[%s1044_s25 + $0x34] sm:$0xf] %vm672_vm1, %v851_v18 }
 0x108   : > { %702 = vst.msk [vmem:[%s1044_s25 + $0x74] sm:$0xf] %vm672_vm1, %v867_v17 }
 0x109 PF: > { %s13_s12 = sadd.s32 1, %s954_s12  }
 0x10a   : > { %p10_p4 = scmp.ge.s32.totalorder %s13_s12, 4  }
 0x10c   :  { %12 = sbr.rel (!%p10_p4) target bundleno = 1 (0x1), region = 62 }

// kernel: bottleneck_pallas.5
= control target key start
LH: loop header
LB: loop body
LE: loop exit
PB: predicated region body
PF: predicated region fallthrough
CT: control target
= control target key end

     0   :  { %vm290_vm0 = vcmask 1043456   ;;  %vm265_vm1 = vcmask 64512   ;;  %vm103_vm2 = vcmask 130048   ;;  %s764_s0 = inlined_call_operand.vmem [shape: bf16[128,8], index: 0, kind: input, shape index: {}]   ;;  %s765_s1 = inlined_call_operand.vmem [shape: bf16[8,32], index: 1, kind: input, shape index: {}]   ;;  %s766_s2 = inlined_call_operand.vmem [shape: bf16[128,16], index: 2, kind: input, shape index: {}]   ;;  %s767_s3 = inlined_call_operand.vmem [shape: bf16[16,32], index: 3, kind: input, shape index: {}]   ;;  %s768_s4 = inlined_call_operand.vmem [shape: f32[1,32], index: 4, kind: input, shape index: {}]   ;;  %s769_s5 = inlined_call_operand.hbm [shape: f32[128,32], index: 5, kind: output, shape index: {}]  }
   0x1   :  { %v38_v0 = vld [vmem:[%s765_s1] sm:$0xf]  ;;  %v573_v4 = vld [vmem:[%s764_s0 + $0x8] sm:$0xff]   ;;  %v576_v7 = vld [vmem:[%s764_s0 + $0x10] sm:$0xff]  }
   0x2   :  { %v571_v1 = vld [vmem:[%s767_s3] sm:$0xff]   ;;  %567 = vmatprep.subr.msk.bf16.mxu0 %vm290_vm0, %v38_v0  ;;  %v292_v2 = vsel %vm290_vm0, %v38_v0, 0  ;;  %v575_v6 = vld [vmem:[%s766_s2 + $0x8] sm:$0xff]   ;;  %v578_v8 = vld [vmem:[%s766_s2 + $0x10] sm:$0xff]  }
   0x3   :  { %v572_v3 = vld [vmem:[%s764_s0] sm:$0xff]   ;;  %534 = vmatpush3.bf16.msra.mxu0 %v292_v2  ;;  %515 = vmatprep.subr.bf16.mxu1 %v571_v1  ;;  %v577_v9 = vld [vmem:[%s764_s0 + $0x18] sm:$0xff]   ;;  %v581_v13 = vld [vmem:[%s764_s0 + $0x28] sm:$0xff]  }
   0x4   :  { %516 = vmatpush3.bf16.msra.mxu1 %v571_v1  ;;  %535 = vmatprep.mubr.msk.bf16.mxu0 %vm265_vm1, %v572_v3  ;;  %v574_v5 = vld [vmem:[%s766_s2] sm:$0xff]   ;;  %v579_v11 = vld [vmem:[%s766_s2 + $0x18] sm:$0xff]  }
   0x5   :  { %517 = vmatprep.mubr.msk.bf16.mxu1 %vm103_vm2, %v574_v5  ;;  %v580_v10 = vld [vmem:[%s764_s0 + $0x20] sm:$0xff]  }
   0x6   :  { %536 = vmatmul.mubr.msk.bf16.vlgmr.msra.gmra.mrb[0].mxu0 %vm265_vm1, %v573_v4  ;;  %v582_v12 = vld [vmem:[%s766_s2 + $0x20] sm:$0xff]  }
   0x7   :  { %518 = vmatmul.mubr.msk.bf16.vlgmr.msra.gmra.mrb[0].mxu1 %vm103_vm2, %v575_v6  ;;  %539 = vmatprep.mubr.msk.bf16.mxu0 %vm265_vm1, %v576_v7 }
   0x8   :  { %521 = vmatprep.mubr.msk.bf16.mxu1 %vm103_vm2, %v578_v8 }
   0xe   :  { %540 = vmatmul.mubr.msk.bf16.gmra.mrb[4].mxu0 %vm265_vm1, %v577_v9 }
   0xf   :  { %543 = vmatprep.mubr.msk.bf16.mxu0 %vm265_vm1, %v580_v10  ;;  %522 = vmatmul.mubr.msk.bf16.gmra.mrb[4].mxu1 %vm103_vm2, %v579_v11 }
  0x10   :  { %525 = vmatprep.mubr.msk.bf16.mxu1 %vm103_vm2, %v582_v12 }
  0x11   :  { %10 = vsyncpa [#allocation3], 0  ;;  %v584_v14 = vld [vmem:[%s764_s0 + $0x30] sm:$0xff]   ;;  %v583_v15 = vld [vmem:[%s766_s2 + $0x28] sm:$0xff]   ;;  %vm430_vm3 = vcmask 261120  }
  0x12   :  { %v586_v16 = vld [vmem:[%s766_s2 + $0x30] sm:$0xff]   ;;  %v585_v17 = vld [vmem:[%s764_s0 + $0x38] sm:$0xff]   ;;  %v718_v22 = vld [vmem:[%s768_s4] ss:$0 sm:$0xff]  ;;  %s612_s0 = smov [#allocation2]  }
  0x13   :  { %v587_v18 = vld [vmem:[%s766_s2 + $0x38] sm:$0xff]   ;;  %s452_s2 = sshll.u32 %s612_s0, 4  ;;  %s453_s2 = int_to_ptr.vmem [resolvable:$true] %s452_s2 }
  0x14   :  { %s588_s4 = scalar_lea.vmem %s453_s2, 2048  ;;  %p593_p1 = scmp.lt.s32.totalorder %s453_s2, %s453_s2 }
  0x15   :  { %p589_p0 = scmp.ne.s32.totalorder %s453_s2, %s588_s4  ;;  %p594_p2 = scmp.lt.s32.totalorder %s588_s4, %s588_s4 }
  0x16   :  { %544 = vmatmul.mubr.msk.bf16.gmra.mrb[8].mxu0 %vm265_vm1, %v581_v13 }
  0x17   :  { %547 = vmatprep.mubr.msk.bf16.mxu0 %vm265_vm1, %v584_v14  ;;  %526 = vmatmul.mubr.msk.bf16.gmra.mrb[8].mxu1 %vm103_vm2, %v583_v15  ;;  %p595_p3 = por %p594_p2, %p593_p1 }
  0x18   :  { %529 = vmatprep.mubr.msk.bf16.mxu1 %vm103_vm2, %v586_v16 }
  0x19   :  { %p596_p4 = pnand %p595_p3, %p589_p0 }
  0x1e   :  { %548 = vmatmul.mubr.msk.bf16.gmra.mrb[12].mxu0 %vm265_vm1, %v585_v17 }
  0x1f   :  { %530 = vmatmul.mubr.msk.bf16.gmra.mrb[12].mxu1 %vm103_vm2, %v587_v18 }
  0xd9   :  { %v537_v19 = vpop.f32.mrb[0].mxu0 }
  0xda   :  { %v328_v20 = vpop.f32.mrb[1].mxu0  ;;  %v519_v21 = vpop.f32.mrb[0].mxu1 }
  0xdb   :  { %v538_v23 = vpop.f32.mrb[2].mxu0  ;;  %v337_v24 = vadd.f32 %v537_v19, %v519_v21  ;;  %v162_v25 = vpop.f32.mrb[1].mxu1 }
  0xdc   :  { %v331_v26 = vpop.f32.mrb[3].mxu0  ;;  %v329_v27 = vadd.f32 %v328_v20, %v162_v25  ;;  %v520_v28 = vpop.f32.mrb[2].mxu1 }
  0xdd   :  { %v400_v29 = vadd.f32 %v718_v22, %v337_v24  ;;  %v340_v30 = vadd.f32 %v538_v23, %v520_v28  ;;  %v165_v31 = vpop.f32.mrb[3].mxu1 }
  0xde   :  { %v398_v32 = vadd.f32 %v718_v22, %v329_v27  ;;  %v332_v33 = vadd.f32 %v331_v26, %v165_v31 }
  0xdf   :  { %v416_v34 = vmax.f32 %v400_v29, 0.0  ;;  %v401_v35 = vadd.f32 %v718_v22, %v340_v30 }
  0xe0   :  { %v414_v36 = vmax.f32 %v398_v32, 0.0  ;;  %v399_v37 = vadd.f32 %v718_v22, %v332_v33 }
  0xe1   :  { %v541_v38 = vpop.f32.mrb[4].mxu0  ;;  %433 = vst.msk [vmem:[#allocation2 + $0x10] sm:$0xff] %vm430_vm3, %v416_v34  ;;  %v417_v39 = vmax.f32 %v401_v35, 0.0 }
  0xe2   :  { %v344_v40 = vpop.f32.mrb[5].mxu0  ;;  %431 = vst.msk [vmem:[#allocation2] sm:$0xff] %vm430_vm3, %v414_v36  ;;  %v415_v41 = vmax.f32 %v399_v37, 0.0  ;;  %v523_v42 = vpop.f32.mrb[4].mxu1 }
  0xe3   :  { %v542_v43 = vpop.f32.mrb[6].mxu0  ;;  %434 = vst.msk [vmem:[#allocation2 + $0x18] sm:$0xff] %vm430_vm3, %v417_v39  ;;  %v353_v44 = vadd.f32 %v541_v38, %v523_v42  ;;  %v178_v45 = vpop.f32.mrb[5].mxu1 }
  0xe4   :  { %v347_v46 = vpop.f32.mrb[7].mxu0  ;;  %432 = vst.msk [vmem:[#allocation2 + $0x8] sm:$0xff] %vm430_vm3, %v415_v41  ;;  %v345_v47 = vadd.f32 %v344_v40, %v178_v45  ;;  %v524_v48 = vpop.f32.mrb[6].mxu1 }
  0xe5   :  { %v404_v49 = vadd.f32 %v718_v22, %v353_v44  ;;  %v356_v50 = vadd.f32 %v542_v43, %v524_v48  ;;  %v181_v51 = vpop.f32.mrb[7].mxu1 }
  0xe6   :  { %v402_v52 = vadd.f32 %v718_v22, %v345_v47  ;;  %v348_v53 = vadd.f32 %v347_v46, %v181_v51 }
  0xe7   :  { %v420_v54 = vmax.f32 %v404_v49, 0.0  ;;  %v405_v55 = vadd.f32 %v718_v22, %v356_v50 }
  0xe8   :  { %v418_v56 = vmax.f32 %v402_v52, 0.0  ;;  %v403_v57 = vadd.f32 %v718_v22, %v348_v53 }
  0xe9   :  { %v545_v58 = vpop.f32.mrb[8].mxu0  ;;  %437 = vst.msk [vmem:[#allocation2 + $0x30] sm:$0xff] %vm430_vm3, %v420_v54  ;;  %v421_v59 = vmax.f32 %v405_v55, 0.0 }
  0xea   :  { %v360_v60 = vpop.f32.mrb[9].mxu0  ;;  %435 = vst.msk [vmem:[#allocation2 + $0x20] sm:$0xff] %vm430_vm3, %v418_v56  ;;  %v419_v61 = vmax.f32 %v403_v57, 0.0  ;;  %v527_v62 = vpop.f32.mrb[8].mxu1 }
  0xeb   :  { %v546_v63 = vpop.f32.mrb[10].mxu0  ;;  %438 = vst.msk [vmem:[#allocation2 + $0x38] sm:$0xff] %vm430_vm3, %v421_v59  ;;  %v369_v0 = vadd.f32 %v545_v58, %v527_v62  ;;  %v194_v1 = vpop.f32.mrb[9].mxu1 }
  0xec   :  { %v363_v2 = vpop.f32.mrb[11].mxu0  ;;  %436 = vst.msk [vmem:[#allocation2 + $0x28] sm:$0xff] %vm430_vm3, %v419_v61  ;;  %v361_v3 = vadd.f32 %v360_v60, %v194_v1  ;;  %v528_v4 = vpop.f32.mrb[10].mxu1 }
  0xed   :  { %v408_v5 = vadd.f32 %v718_v22, %v369_v0  ;;  %v372_v6 = vadd.f32 %v546_v63, %v528_v4  ;;  %v197_v7 = vpop.f32.mrb[11].mxu1 }
  0xee   :  { %v406_v8 = vadd.f32 %v718_v22, %v361_v3  ;;  %v364_v9 = vadd.f32 %v363_v2, %v197_v7 }
  0xef   :  { %v424_v10 = vmax.f32 %v408_v5, 0.0  ;;  %v409_v11 = vadd.f32 %v718_v22, %v372_v6 }
  0xf0   :  { %v422_v12 = vmax.f32 %v406_v8, 0.0  ;;  %v407_v13 = vadd.f32 %v718_v22, %v364_v9 }
  0xf1   :  { %v549_v14 = vpop.f32.mrb[12].mxu0  ;;  %441 = vst.msk [vmem:[#allocation2 + $0x50] sm:$0xff] %vm430_vm3, %v424_v10  ;;  %v425_v15 = vmax.f32 %v409_v11, 0.0 }
  0xf2   :  { %v376_v16 = vpop.f32.mrb[13].mxu0  ;;  %439 = vst.msk [vmem:[#allocation2 + $0x40] sm:$0xff] %vm430_vm3, %v422_v12  ;;  %v423_v17 = vmax.f32 %v407_v13, 0.0  ;;  %v531_v18 = vpop.f32.mrb[12].mxu1 }
  0xf3   :  { %v550_v19 = vpop.f32.mrb[14].mxu0  ;;  %442 = vst.msk [vmem:[#allocation2 + $0x58] sm:$0xff] %vm430_vm3, %v425_v15  ;;  %v385_v20 = vadd.f32 %v549_v14, %v531_v18  ;;  %v210_v21 = vpop.f32.mrb[13].mxu1 }
  0xf4   :  { %v379_v23 = vpop.f32.mrb[15].mxu0  ;;  %440 = vst.msk [vmem:[#allocation2 + $0x48] sm:$0xff] %vm430_vm3, %v423_v17  ;;  %v377_v24 = vadd.f32 %v376_v16, %v210_v21  ;;  %v532_v25 = vpop.f32.mrb[14].mxu1 }
  0xf5   :  { %v412_v26 = vadd.f32 %v718_v22, %v385_v20  ;;  %v388_v27 = vadd.f32 %v550_v19, %v532_v25  ;;  %v213_v28 = vpop.f32.mrb[15].mxu1 }
  0xf6   :  { %v410_v29 = vadd.f32 %v718_v22, %v377_v24  ;;  %v380_v30 = vadd.f32 %v379_v23, %v213_v28 }
  0xf7   :  { %v428_v31 = vmax.f32 %v412_v26, 0.0  ;;  %v413_v32 = vadd.f32 %v718_v22, %v388_v27 }
  0xf8   :  { %v426_v33 = vmax.f32 %v410_v29, 0.0  ;;  %v411_v34 = vadd.f32 %v718_v22, %v380_v30 }
  0xf9   :  { %445 = vst.msk [vmem:[#allocation2 + $0x70] sm:$0xff] %vm430_vm3, %v428_v31  ;;  %v429_v35 = vmax.f32 %v413_v32, 0.0 }
  0xfa   :  { %443 = vst.msk [vmem:[#allocation2 + $0x60] sm:$0xff] %vm430_vm3, %v426_v33  ;;  %v427_v36 = vmax.f32 %v411_v34, 0.0 }
  0xfb   :  { %446 = vst.msk [vmem:[#allocation2 + $0x78] sm:$0xff] %vm430_vm3, %v429_v35 }
  0xfc   :  { %444 = vst.msk [vmem:[#allocation2 + $0x68] sm:$0xff] %vm430_vm3, %v427_v36 }
  0xfd   :  { %599 = shalt.err (!%p596_p4)
}
  0xfe   :  { %s600_s29 = scalar_lea.hbm %s769_s5, 2048 }
  0xff   :  { %p601_p5 = scmp.ne.s32.totalorder %s769_s5, %s600_s29  ;;  %p604_p6 = scmp.lt.u32.totalorder %s600_s29, %s769_s5 }
 0x101   :  { %p606_p7 = pnand %p604_p6, %p601_p5 }
 0x103   :  { %609 = shalt.err (!%p606_p7)
}
 0x104   :  { %s613_s9 = smov 128   ;;  %s614_s10 = smov 8  }
 0x105   :  { %458 = dma.vmem_to_hbm [thread:$0]  %s453_s2, 2048, %s769_s5, [#allocation3], %s613_s9, %s613_s9, %s614_s10  }
 0x106   :  { %610 = dma.done.wait [#allocation3], 2048  }
 0x107   :  { %611 = vsyncadd [#allocation3], 4294965248 }
 0x108   :  { %462 = vsyncpa [#allocation3], 1 }

// kernel: bottleneck_pallas.4
= control target key start
LH: loop header
LB: loop body
LE: loop exit
PB: predicated region body
PF: predicated region fallthrough
CT: control target
= control target key end

     0   :  { %s2094_s12 = smov 0   ;;  %s2373_s0 = inlined_call_operand.vmem [shape: bf16[2,4,9,9,8], index: 0, kind: input, shape index: {}]   ;;  %s2374_s1 = inlined_call_operand.vmem [shape: bf16[9,8,8], index: 1, kind: input, shape index: {}]   ;;  %s2375_s2 = inlined_call_operand.vmem [shape: f32[1,8], index: 2, kind: input, shape index: {}]   ;;  %s2376_s3 = inlined_call_operand.vmem [shape: bf16[2,8,8,8], index: 3, kind: output, shape index: {}]  }
   0x1 LB: > { %s1658_s13 = sadd.s32 4294967295, %s2072_s12   ;;  %p1662_p0 = scmp.ge.s32.totalorder %s2072_s12, 1  ;;  %s2072_s12 = sphi %s2094_s12, %s13_s12  }
   0x2   : > { %p137_p1 = scmp.lt.s32.totalorder %s2072_s12, 3 }
   0x4   : > { %p138_p2 = pnand %p1662_p0, %p137_p1 }
   0x5   : > { %v1674_v0 = vld [vmem:[%s2374_s1 + $0x4] sm:$0xf] (!%p138_p2)  ;;  %vm225_vm0 = vcmask (!%p138_p2), 1043456   ;;  %v2108_v1 = vld [vmem:[%s2374_s1 + $0x10] sm:$0xf] (!%p138_p2)  ;;  %p161_p3 = scmp.lt.s32.totalorder (!%p138_p2), %s1658_s13, 1 }
   0x6   : > { %141 = sbr.rel (%p138_p2) target bundleno = 318 (0x13e), region = 32  ;;  %2023 = vmatprep.subr.msk.bf16.mxu1 (!%p138_p2), %vm225_vm0, %v1674_v0  ;;  %2027 = vmatprep.subr.msk.bf16.mxu0 (!%p138_p2), %vm225_vm0, %v2108_v1  ;;  %v227_v2 = vsel (!%p138_p2), %vm225_vm0, %v1674_v0, 0  ;;  %v2116_v3 = vsel (!%p138_p2), %vm225_vm0, %v2108_v1, 0  ;;  %v180_v4 = vld [vmem:[%s2374_s1] sm:$0xf] (!%p138_p2)  ;;  %vm212_vm1 = vcmask (!%p138_p2), 64512  }
   0x7   : > { %1868 = vmatpush3.bf16.msra.mxu1 (!%p138_p2), %v227_v2  ;;  %1908 = vmatpush3.bf16.msra.mxu0 (!%p138_p2), %v2116_v3  ;;  %v1750_v5 = vld [vmem:[%s2374_s1 + $0x14] sm:$0xf] (!%p138_p2)  ;;  %v327_v6 = vsel (!%p138_p2), %vm225_vm0, %v180_v4, 0  ;;  %v1767_v9 = vld [vmem:[%s2374_s1 + $0x18] sm:$0xf] (!%p138_p2)  ;;  %vm1594_vm5 = vcmask (!%p138_p2), 60416  }
   0x8   : > { %2024 = vmatprep.subr.msk.bf16.mxu1 (!%p138_p2), %vm225_vm0, %v180_v4  ;;  %2029 = vmatprep.subr.msk.bf16.mxu0 (!%p138_p2), %vm225_vm0, %v1750_v5  ;;  %v1020_v7 = vsel (!%p138_p2), %vm225_vm0, %v1750_v5, 0  ;;  %v1691_v10 = vld [vmem:[%s2374_s1 + $0x8] sm:$0xf] (!%p138_p2)  ;;  %vm410_vm2 = vsmask.f32 (!%p138_p2), 3328  ;;  %v2153_v15 = vsel (!%p138_p2), %vm225_vm0, %v1767_v9, 0 }
   0x9   : > { %vm411_vm3 = vsmask.f32 (!%p138_p2), 7440  ;;  %v2156_v16 = vsel (!%p138_p2), %vm225_vm0, %v1691_v10, 0 }
   0xa   : > { %vm2173_vm4 = vmor (!%p138_p2), %vm410_vm2, %vm411_vm3 }
   0xd   : > { %s2380_s13 = smov (!%p161_p3, %s1658_s13), 1 }
   0xe   : > { %s2033_s22 = smul.u32 288, %s2380_s13  ;;  %s1821_s11 = sshll.u32 %s2380_s13, 5 }
   0xf   : > { %s2352_s16 = scalar_lea.vmem %s2376_s3, %s1821_s11 }
  0x10   : > { %s2133_s25 = scalar_lea.vmem %s2373_s0, %s2033_s22 }
  0x11   : > { %v2042_v8 = vld [vmem:[%s2133_s25 + $0x48] ss:$8 sps:$4 sm:$0xff]   ;;  %v2043_v11 = vld [vmem:[%s2133_s25 + $0xd8] ss:$8 sps:$4 sm:$0xff]   ;;  %v1735_v19 = vld [vmem:[%s2133_s25 + $0x94] sm:$0x1] }
  0x12   : > { %1869 = vmatprep.mubr.msk.bf16.mxu1 %vm212_vm1, %v2042_v8  ;;  %v2044_v12 = vld [vmem:[%s2133_s25 + $0x58] ss:$8 sps:$4 sm:$0xff]   ;;  %1909 = vmatprep.mubr.msk.bf16.mxu0 %vm212_vm1, %v2043_v11  ;;  %v2045_v13 = vld [vmem:[%s2133_s25 + $0xe8] ss:$8 sps:$4 sm:$0xff]   ;;  %v1737_v21 = vld [vmem:[%s2133_s25 + $0x9c] sm:$0x1] }
  0x13   : > { %1870 = vmatmul.mubr.msk.bf16.vlgmr.msra.gmra.mrb[0].mxu1 %vm212_vm1, %v2044_v12  ;;  %v2046_v14 = vld [vmem:[%s2133_s25 + $0x68] ss:$8 sps:$4 sm:$0xff]   ;;  %1910 = vmatmul.mubr.msk.bf16.vlgmr.msra.gmra.mrb[0].mxu0 %vm212_vm1, %v2045_v13  ;;  %v2047_v17 = vld [vmem:[%s2133_s25 + $0x78] ss:$8 sps:$4 sm:$0xff]   ;;  %v891_v24 = vshll.u32 %v1735_v19, 16  ;;  %v905_v27 = vshll.u32 %v1737_v21, 16 }
  0x14   : > { %1878 = vmatpush3.bf16.msra.mxu1 %v327_v6  ;;  %1918 = vmatpush3.bf16.msra.mxu0 %v1020_v7  ;;  %v1734_v18 = vld [vmem:[%s2133_s25 + $0x90] sm:$0xf]  ;;  %v1736_v20 = vld [vmem:[%s2133_s25 + $0x98] sm:$0xf]  ;;  %v1738_v28 = vld [vmem:[%s2133_s25 + $0xa0] sm:$0xf] }
  0x15   : > { %1873 = vmatprep.mubr.msk.bf16.mxu1 %vm212_vm1, %v2046_v14  ;;  %v882_v22 = vshrl.u32 %v1734_v18, 16  ;;  %v885_v23 = vshll.u32 %v1734_v18, 16  ;;  %v896_v25 = vshrl.u32 %v1736_v20, 16  ;;  %2030 = vmatprep.subr.msk.bf16.mxu0 %vm225_vm0, %v1767_v9  ;;  %v899_v26 = vshll.u32 %v1736_v20, 16  ;;  %v1739_v29 = vld [vmem:[%s2133_s25 + $0xa4] sm:$0x1] }
  0x16   : > { %2025 = vmatprep.subr.msk.bf16.mxu1 %vm225_vm0, %v1691_v10  ;;  %v893_v32 = vrot.slane %v891_v24, 5  ;;  %v1740_v34 = vld [vmem:[%s2133_s25 + $0xa8] sm:$0xf]  ;;  %v907_v36 = vrot.slane %v905_v27, 5  ;;  %v1741_v37 = vld [vmem:[%s2133_s25 + $0xac] sm:$0x1] }
  0x17   : > { %v884_v30 = vrot.slane %v882_v22, 4  ;;  %v887_v31 = vrot.slane %v885_v23, 5  ;;  %v898_v33 = vrot.slane %v896_v25, 4  ;;  %v901_v35 = vrot.slane %v899_v26, 5  ;;  %v2048_v53 = vld [vmem:[%s2133_s25] ss:$8 sps:$4 sm:$0xff]  }
  0x18   : > { %v910_v38 = vshrl.u32 %v1738_v28, 16  ;;  %v913_v39 = vshll.u32 %v1738_v28, 16  ;;  %v919_v41 = vshll.u32 %v1739_v29, 16  ;;  %v924_v42 = vshrl.u32 %v1740_v34, 16  ;;  %v2049_v59 = vld [vmem:[%s2133_s25 + $0x10] ss:$8 sps:$4 sm:$0xff]  }
  0x19   : > { %v888_v40 = vor.u32 %v887_v31, %v884_v30  ;;  %v927_v43 = vshll.u32 %v1740_v34, 16  ;;  %v902_v45 = vor.u32 %v901_v35, %v898_v33  ;;  %v933_v48 = vshll.u32 %v1741_v37, 16  ;;  %v1742_v60 = vld [vmem:[%s2133_s25 + $0xb0] sm:$0xf]  ;;  %v1743_v61 = vld [vmem:[%s2133_s25 + $0xb4] sm:$0x1] }
  0x1a   : > { %v912_v46 = vrot.slane %v910_v38, 4  ;;  %v915_v47 = vrot.slane %v913_v39, 5  ;;  %v921_v50 = vrot.slane %v919_v41, 5  ;;  %v926_v51 = vrot.slane %v924_v42, 4  ;;  %v1744_v0 = vld [vmem:[%s2133_s25 + $0xb8] sm:$0xf] }
  0x1b   : > { %1874 = vmatmul.mubr.msk.bf16.gmra.mrb[4].mxu1 %vm212_vm1, %v2047_v17  ;;  %v889_v49 = vrot.slane %v888_v40, 4  ;;  %v929_v52 = vrot.slane %v927_v43, 5  ;;  %v903_v54 = vrot.slane %v902_v45, 4  ;;  %v935_v56 = vrot.slane %v933_v48, 5  ;;  %v1745_v2 = vld [vmem:[%s2133_s25 + $0xbc] sm:$0x1] }
  0x1c   : > { %v916_v55 = vor.u32 %v915_v47, %v912_v46  ;;  %1879 = vmatprep.mubr.msk.bf16.mxu1 %vm212_vm1, %v2048_v53  ;;  %v938_v4 = vshrl.u32 %v1742_v60, 16  ;;  %v941_v7 = vshll.u32 %v1742_v60, 16  ;;  %v947_v8 = vshll.u32 %v1743_v61, 16  ;;  %v1746_v9 = vld [vmem:[%s2133_s25 + $0xc0] sm:$0xf] }
  0x1d   : > { %v894_v57 = vsel %vm2173_vm4, %v889_v49, %v893_v32  ;;  %v930_v58 = vor.u32 %v929_v52, %v926_v51  ;;  %v908_v62 = vsel %vm2173_vm4, %v903_v54, %v907_v36  ;;  %v2192_v10 = vld [vmem:[%s2374_s1 + $0xc] sm:$0xf]  ;;  %v952_v13 = vshrl.u32 %v1744_v0, 16  ;;  %v1747_v17 = vld [vmem:[%s2133_s25 + $0xc4] sm:$0x1] }
  0x1e   : > { %v917_v63 = vrot.slane %v916_v55, 4  ;;  %v1751_v5 = vcombine.low %v894_v57, %v908_v62  ;;  %v940_v12 = vrot.slane %v938_v4, 4  ;;  %v955_v14 = vshll.u32 %v1744_v0, 16  ;;  %v1748_v22 = vld [vmem:[%s2133_s25 + $0xc8] sm:$0xf] }
  0x1f   : > { %v931_v6 = vrot.slane %v930_v58, 4  ;;  %v943_v19 = vrot.slane %v941_v7, 5  ;;  %v949_v20 = vrot.slane %v947_v8, 5  ;;  %v961_v21 = vshll.u32 %v1745_v2, 16  ;;  %v2204_v23 = vld [vmem:[%s2374_s1 + $0x1c] sm:$0xf] }
  0x20   : > { %v922_v11 = vsel %vm2173_vm4, %v917_v63, %v921_v50  ;;  %1919 = vmatprep.mubr.msk.bf16.mxu0 %vm212_vm1, %v1751_v5  ;;  %v954_v25 = vrot.slane %v952_v13, 4  ;;  %v957_v26 = vrot.slane %v955_v14, 5  ;;  %v1749_v27 = vld [vmem:[%s2133_s25 + $0xcc] sm:$0x1]  ;;  %v966_v28 = vshrl.u32 %v1746_v9, 16 }
  0x21   : > { %v936_v18 = vsel %vm2173_vm4, %v931_v6, %v935_v56  ;;  %v944_v29 = vor.u32 %v943_v19, %v940_v12  ;;  %v963_v30 = vrot.slane %v961_v21, 5  ;;  %v969_v31 = vshll.u32 %v1746_v9, 16  ;;  %v2052_v53 = vld [vmem:[%s2133_s25 + $0x8] ss:$8 sps:$4 sm:$0xff]   ;;  %v394_v54 = vld [vmem:[%s2133_s25] sm:$0xf] }
  0x22   : > { %v1752_v24 = vcombine.low %v922_v11, %v936_v18  ;;  %v975_v32 = vshll.u32 %v1747_v17, 16  ;;  %v958_v33 = vor.u32 %v957_v26, %v954_v25  ;;  %v968_v34 = vrot.slane %v966_v28, 4  ;;  %v395_v56 = vld [vmem:[%s2133_s25 + $0x4] sm:$0x1]  ;;  %v396_v57 = vld [vmem:[%s2133_s25 + $0x8] sm:$0xf] }
  0x23   : > { %1880 = vmatmul.mubr.msk.bf16.vlgmr.msra.gmra.mrb[0].mxu1 %vm212_vm1, %v2049_v59  ;;  %v980_v35 = vshrl.u32 %v1748_v22, 16  ;;  %v983_v36 = vshll.u32 %v1748_v22, 16  ;;  %v945_v37 = vrot.slane %v944_v29, 4  ;;  %v971_v38 = vrot.slane %v969_v31, 5  ;;  %v397_v58 = vld [vmem:[%s2133_s25 + $0xc] sm:$0x1] }
  0x24   : > { %1888 = vmatpush3.bf16.msra.mxu1 %v2156_v16  ;;  %1920 = vmatmul.mubr.msk.bf16.vlgmr.msra.gmra.mrb[0].mxu0 %vm212_vm1, %v1752_v24  ;;  %v989_v39 = vshll.u32 %v1749_v27, 16  ;;  %v2050_v16 = vld [vmem:[%s2133_s25 + $0x20] ss:$8 sps:$4 sm:$0xff]   ;;  %v959_v40 = vrot.slane %v958_v33, 4  ;;  %v977_v46 = vrot.slane %v975_v32, 5  ;;  %v414_v60 = vshrl.u32 %v394_v54, 16 }
  0x25   : > { %2026 = vmatprep.subr.msk.bf16.mxu1 %vm225_vm0, %v2192_v10  ;;  %1928 = vmatpush3.bf16.msra.mxu0 %v2153_v15  ;;  %v982_v41 = vrot.slane %v980_v35, 4  ;;  %v985_v42 = vrot.slane %v983_v36, 5  ;;  %v950_v43 = vsel %vm2173_vm4, %v945_v37, %v949_v20  ;;  %v972_v45 = vor.u32 %v971_v38, %v968_v34  ;;  %v2051_v15 = vld [vmem:[%s2133_s25 + $0x30] ss:$8 sps:$4 sm:$0xff]   ;;  %v399_v6 = vld [vmem:[%s2133_s25 + $0x14] sm:$0x1] }
  0x26   : > { %2031 = vmatprep.subr.msk.bf16.mxu0 %vm225_vm0, %v2204_v23  ;;  %1883 = vmatprep.mubr.msk.bf16.mxu1 %vm212_vm1, %v2050_v16  ;;  %v964_v47 = vsel %vm2173_vm4, %v959_v40, %v963_v30  ;;  %v991_v49 = vrot.slane %v989_v39, 5  ;;  %v417_v61 = vshll.u32 %v394_v54, 16  ;;  %v423_v62 = vshll.u32 %v395_v56, 16  ;;  %v398_v63 = vld [vmem:[%s2133_s25 + $0x10] sm:$0xf] }
  0x27   : > { %v986_v48 = vor.u32 %v985_v42, %v982_v41  ;;  %v1753_v50 = vcombine.low %v950_v43, %v964_v47  ;;  %v973_v51 = vrot.slane %v972_v45, 4  ;;  %v428_v2 = vshrl.u32 %v396_v57, 16  ;;  %v400_v11 = vld [vmem:[%s2133_s25 + $0x18] sm:$0xf]  ;;  %v401_v18 = vld [vmem:[%s2133_s25 + $0x1c] sm:$0x1] }
  0x28   : > { %v431_v4 = vshll.u32 %v396_v57, 16  ;;  %v437_v5 = vshll.u32 %v397_v58, 16  ;;  %v416_v7 = vrot.slane %v414_v60, 4  ;;  %v419_v8 = vrot.slane %v417_v61, 5  ;;  %v2053_v29 = vld [vmem:[%s2133_s25 + $0x18] ss:$8 sps:$4 sm:$0xff]  }
  0x29   : > { %v987_v52 = vrot.slane %v986_v48, 4  ;;  %1923 = vmatprep.mubr.msk.bf16.mxu0 %vm212_vm1, %v1753_v50  ;;  %v978_v55 = vsel %vm2173_vm4, %v973_v51, %v977_v46  ;;  %v425_v9 = vrot.slane %v423_v62, 5  ;;  %v442_v12 = vshrl.u32 %v398_v63, 16  ;;  %v2054_v37 = vld [vmem:[%s2133_s25 + $0x28] ss:$8 sps:$4 sm:$0xff]  }
  0x2a   : > { %v430_v13 = vrot.slane %v428_v2, 4  ;;  %v433_v14 = vrot.slane %v431_v4, 5  ;;  %v439_v17 = vrot.slane %v437_v5, 5  ;;  %v445_v19 = vshll.u32 %v398_v63, 16  ;;  %v402_v40 = vld [vmem:[%s2133_s25 + $0x20] sm:$0xf] }
  0x2b   : > { %1884 = vmatmul.mubr.msk.bf16.gmra.mrb[4].mxu1 %vm212_vm1, %v2051_v15  ;;  %v992_v59 = vsel %vm2173_vm4, %v987_v52, %v991_v49  ;;  %v420_v20 = vor.u32 %v419_v8, %v416_v7  ;;  %v444_v21 = vrot.slane %v442_v12, 4  ;;  %v451_v22 = vshll.u32 %v399_v6, 16  ;;  %v403_v45 = vld [vmem:[%s2133_s25 + $0x24] sm:$0x1]  ;;  %v404_v46 = vld [vmem:[%s2133_s25 + $0x28] sm:$0xf] }
  0x2c   : > { %v1754_v0 = vcombine.low %v978_v55, %v992_v59  ;;  %v456_v24 = vshrl.u32 %v400_v11, 16  ;;  %v434_v25 = vor.u32 %v433_v14, %v430_v13  ;;  %v447_v26 = vrot.slane %v445_v19, 5  ;;  %v405_v48 = vld [vmem:[%s2133_s25 + $0x2c] sm:$0x1]  ;;  %v406_v55 = vld [vmem:[%s2133_s25 + $0x30] sm:$0xf] }
  0x2d   : > { %v459_v27 = vshll.u32 %v400_v11, 16  ;;  %v465_v28 = vshll.u32 %v401_v18, 16  ;;  %v1258_v30 = vsel %vm225_vm0, %v2204_v23, 0  ;;  %v421_v31 = vrot.slane %v420_v20, 4  ;;  %v2251_v23 = vld [vmem:[%s2374_s1 + $0x20] sm:$0xf] }
  0x2e   : > { %1924 = vmatmul.mubr.msk.bf16.gmra.mrb[4].mxu0 %vm212_vm1, %v1754_v0  ;;  %v453_v32 = vrot.slane %v451_v22, 5  ;;  %v458_v33 = vrot.slane %v456_v24, 4  ;;  %v435_v34 = vrot.slane %v434_v25, 4  ;;  %v448_v35 = vor.u32 %v447_v26, %v444_v21  ;;  %v407_v60 = vld [vmem:[%s2133_s25 + $0x34] sm:$0x1] }
  0x2f   : > { %1929 = vmatprep.mubr.msk.bf16.mxu0 %vm212_vm1, %v2052_v53  ;;  %v461_v36 = vrot.slane %v459_v27, 5  ;;  %v426_v38 = vsel %vm2173_vm4, %v421_v31, %v425_v9  ;;  %v467_v39 = vrot.slane %v465_v28, 5  ;;  %v671_v16 = vsel %vm225_vm0, %v2192_v10, 0  ;;  %v2055_v62 = vld [vmem:[%s2133_s25 + $0x38] ss:$8 sps:$4 sm:$0xff]  }
  0x30   : > { %v440_v41 = vsel %vm2173_vm4, %v435_v34, %v439_v17  ;;  %v449_v42 = vrot.slane %v448_v35, 4  ;;  %v470_v15 = vshrl.u32 %v402_v40, 16  ;;  %v473_v49 = vshll.u32 %v402_v40, 16  ;;  %v408_v0 = vld [vmem:[%s2133_s25 + $0x38] sm:$0xf] }
  0x31   : > { %v462_v43 = vor.u32 %v461_v36, %v458_v33  ;;  %v1692_v47 = vcombine.low %v426_v38, %v440_v41  ;;  %v479_v10 = vshll.u32 %v403_v45, 16  ;;  %v484_v50 = vshrl.u32 %v404_v46, 16  ;;  %v409_v2 = vld [vmem:[%s2133_s25 + $0x3c] sm:$0x1]  ;;  %v2056_v14 = vld [vmem:[%s2133_s25 + $0x50] ss:$8 sps:$4 sm:$0xff]  }
  0x32   : > { %v454_v51 = vsel %vm2173_vm4, %v449_v42, %v453_v32  ;;  %v472_v53 = vrot.slane %v470_v15, 4  ;;  %v487_v54 = vshll.u32 %v404_v46, 16  ;;  %v475_v56 = vrot.slane %v473_v49, 5  ;;  %v2057_v35 = vld [vmem:[%s2133_s25 + $0x60] ss:$8 sps:$4 sm:$0xff]  }
  0x33   : > { %v463_v52 = vrot.slane %v462_v43, 4  ;;  %1889 = vmatprep.mubr.msk.bf16.mxu1 %vm212_vm1, %v1692_v47  ;;  %v481_v57 = vrot.slane %v479_v10, 5  ;;  %v486_v58 = vrot.slane %v484_v50, 4  ;;  %v493_v59 = vshll.u32 %v405_v48, 16  ;;  %v1794_v40 = vld [vmem:[%s2133_s25 + $0xc] sm:$0x1] }
  0x34   : > { %v489_v63 = vrot.slane %v487_v54, 5  ;;  %v498_v4 = vshrl.u32 %v406_v55, 16  ;;  %v476_v6 = vor.u32 %v475_v56, %v472_v53  ;;  %v501_v8 = vshll.u32 %v406_v55, 16  ;;  %v1795_v41 = vld [vmem:[%s2133_s25 + $0x10] sm:$0xf] }
  0x35   : > { %v468_v61 = vsel %vm2173_vm4, %v463_v52, %v467_v39  ;;  %v495_v7 = vrot.slane %v493_v59, 5  ;;  %v507_v12 = vshll.u32 %v407_v60, 16  ;;  %v512_v13 = vshrl.u32 %v408_v0, 16  ;;  %v2060_v39 = vld [vmem:[%s2133_s25 + $0x70] ss:$8 sps:$4 sm:$0xff]  }
  0x36   : > { %1930 = vmatmul.mubr.msk.bf16.vlgmr.msra.gmra.mrb[0].mxu0 %vm212_vm1, %v2053_v29  ;;  %v1693_v5 = vcombine.low %v454_v51, %v468_v61  ;;  %v490_v9 = vor.u32 %v489_v63, %v486_v58  ;;  %v500_v11 = vrot.slane %v498_v4, 4  ;;  %v477_v17 = vrot.slane %v476_v6, 4  ;;  %v1796_v42 = vld [vmem:[%s2133_s25 + $0x14] sm:$0x1]  ;;  %v1797_v48 = vld [vmem:[%s2133_s25 + $0x18] sm:$0xf] }
  0x37   : > { %1938 = vmatpush3.bf16.msra.mxu0 %v1258_v30  ;;  %1933 = vmatprep.mubr.msk.bf16.mxu0 %vm212_vm1, %v2054_v37  ;;  %v503_v18 = vrot.slane %v501_v8, 5  ;;  %v515_v19 = vshll.u32 %v408_v0, 16  ;;  %v521_v20 = vshll.u32 %v409_v2, 16  ;;  %v514_v22 = vrot.slane %v512_v13, 4  ;;  %v2058_v37 = vld [vmem:[%s2133_s25 + $0x90] ss:$8 sps:$4 sm:$0xff]  }
  0x38   : > { %2032 = vmatprep.subr.msk.bf16.mxu0 %vm225_vm0, %v2251_v23  ;;  %1890 = vmatmul.mubr.msk.bf16.vlgmr.msra.gmra.mrb[0].mxu1 %vm212_vm1, %v1693_v5  ;;  %v491_v21 = vrot.slane %v490_v9, 4  ;;  %v482_v24 = vsel %vm2173_vm4, %v477_v17, %v481_v57  ;;  %v509_v26 = vrot.slane %v507_v12, 5  ;;  %v1488_v34 = vsel %vm225_vm0, %v2251_v23, 0  ;;  %v1798_v50 = vld [vmem:[%s2133_s25 + $0x1c] sm:$0x1] }
  0x39   : > { %1898 = vmatpush3.bf16.msra.mxu1 %v671_v16  ;;  %v504_v25 = vor.u32 %v503_v18, %v500_v11  ;;  %v517_v27 = vrot.slane %v515_v19, 5  ;;  %v523_v32 = vrot.slane %v521_v20, 5  ;;  %v1793_v16 = vld [vmem:[%s2133_s25 + $0x8] sm:$0xf]  ;;  %v1359_v23 = vshll.u32 %v1794_v40, 16 }
  0x3a   : > { %2028 = vmatprep.subr.msk.bf16.mxu1 %vm225_vm0, %v2108_v1  ;;  %v496_v28 = vsel %vm2173_vm4, %v491_v21, %v495_v7  ;;  %v1350_v43 = vshrl.u32 %v1793_v16, 16  ;;  %v1353_v45 = vshll.u32 %v1793_v16, 16  ;;  %v1364_v46 = vshrl.u32 %v1795_v41, 16  ;;  %v1799_v51 = vld [vmem:[%s2133_s25 + $0x20] sm:$0xf] }
  0x3b   : > { %v1694_v29 = vcombine.low %v482_v24, %v496_v28  ;;  %v505_v30 = vrot.slane %v504_v25, 4  ;;  %v518_v31 = vor.u32 %v517_v27, %v514_v22  ;;  %v1367_v15 = vshll.u32 %v1795_v41, 16  ;;  %v2059_v52 = vld [vmem:[%s2133_s25 + $0xa0] ss:$8 sps:$4 sm:$0xff]   ;;  %v1800_v58 = vld [vmem:[%s2133_s25 + $0x24] sm:$0x1] }
  0x3c   : > { %v1373_v47 = vshll.u32 %v1796_v42, 16  ;;  %v1352_v49 = vrot.slane %v1350_v43, 4  ;;  %v1355_v10 = vrot.slane %v1353_v45, 5  ;;  %v2061_v53 = vld [vmem:[%s2133_s25 + $0x80] ss:$8 sps:$4 sm:$0xff]   ;;  %v1361_v54 = vrot.slane %v1359_v23, 5 }
  0x3d   : > { %1893 = vmatprep.mubr.msk.bf16.mxu1 %vm212_vm1, %v1694_v29  ;;  %v510_v1 = vsel %vm2173_vm4, %v505_v30, %v509_v26  ;;  %v519_v33 = vrot.slane %v518_v31, 4  ;;  %v1366_v55 = vrot.slane %v1364_v46, 4  ;;  %v1369_v56 = vrot.slane %v1367_v15, 5  ;;  %v2062_v5 = vld [vmem:[%s2133_s25 + $0xb0] ss:$8 sps:$4 sm:$0xff]  }
  0x3e   : > { %1934 = vmatmul.mubr.msk.bf16.gmra.mrb[4].mxu0 %vm212_vm1, %v2055_v62  ;;  %v1375_v57 = vrot.slane %v1373_v47, 5  ;;  %v1356_v59 = vor.u32 %v1355_v10, %v1352_v49  ;;  %v1378_v60 = vshrl.u32 %v1797_v48, 16  ;;  %v1381_v61 = vshll.u32 %v1797_v48, 16  ;;  %v1801_v17 = vld [vmem:[%s2133_s25 + $0x28] sm:$0xf] }
  0x3f   : > { %1939 = vmatprep.mubr.msk.bf16.mxu0 %vm212_vm1, %v2056_v14  ;;  %v524_v36 = vsel %vm2173_vm4, %v519_v33, %v523_v32  ;;  %v1387_v62 = vshll.u32 %v1798_v50, 16  ;;  %v1370_v63 = vor.u32 %v1369_v56, %v1366_v55  ;;  %v1392_v0 = vshrl.u32 %v1799_v51, 16  ;;  %v1802_v20 = vld [vmem:[%s2133_s25 + $0x2c] sm:$0x1]  ;;  %v1803_v21 = vld [vmem:[%s2133_s25 + $0x30] sm:$0xf] }
  0x40   : > { %v1695_v38 = vcombine.low %v510_v1, %v524_v36  ;;  %v1395_v2 = vshll.u32 %v1799_v51, 16  ;;  %v1401_v4 = vshll.u32 %v1800_v58, 16  ;;  %v1357_v6 = vrot.slane %v1356_v59, 4  ;;  %v1804_v22 = vld [vmem:[%s2133_s25 + $0x34] sm:$0x1] }
  0x41   : > { %v1380_v7 = vrot.slane %v1378_v60, 4  ;;  %v1383_v8 = vrot.slane %v1381_v61, 5  ;;  %v1389_v9 = vrot.slane %v1387_v62, 5  ;;  %v1371_v11 = vrot.slane %v1370_v63, 4  ;;  %v2063_v32 = vld [vmem:[%s2133_s25 + $0xc0] ss:$8 sps:$4 sm:$0xff]  }
  0x42   : > { %1894 = vmatmul.mubr.msk.bf16.gmra.mrb[4].mxu1 %vm212_vm1, %v1695_v38  ;;  %v1394_v12 = vrot.slane %v1392_v0, 4  ;;  %v1397_v13 = vrot.slane %v1395_v2, 5  ;;  %v1403_v14 = vrot.slane %v1401_v4, 5  ;;  %v1362_v18 = vsel %vm2173_vm4, %v1357_v6, %v1361_v54  ;;  %v1805_v36 = vld [vmem:[%s2133_s25 + $0x38] sm:$0xf] }
  0x43   : > { %1899 = vmatprep.mubr.msk.bf16.mxu1 %vm212_vm1, %v2058_v37  ;;  %v1384_v19 = vor.u32 %v1383_v8, %v1380_v7  ;;  %v1376_v24 = vsel %vm2173_vm4, %v1371_v11, %v1375_v57  ;;  %v1406_v26 = vshrl.u32 %v1801_v17, 16  ;;  %v1409_v27 = vshll.u32 %v1801_v17, 16  ;;  %v1806_v16 = vld [vmem:[%s2133_s25 + $0x3c] sm:$0x1]  ;;  %v1807_v43 = vld [vmem:[%s2133_s25 + $0x40] sm:$0xf] }
  0x44   : > { %v1398_v25 = vor.u32 %v1397_v13, %v1394_v12  ;;  %v1810_v28 = vcombine.low %v1362_v18, %v1376_v24  ;;  %v1415_v30 = vshll.u32 %v1802_v20, 16  ;;  %v1420_v31 = vshrl.u32 %v1803_v21, 16  ;;  %v1808_v45 = vld [vmem:[%s2133_s25 + $0x44] sm:$0x1]  ;;  %v2064_v15 = vld [vmem:[%s2133_s25 + $0xf8] ss:$8 sps:$4 sm:$0xff]  }
  0x45   : > { %v1385_v29 = vrot.slane %v1384_v19, 4  ;;  %v1408_v33 = vrot.slane %v1406_v26, 4  ;;  %v1434_v23 = vshrl.u32 %v1805_v36, 16  ;;  %v1437_v48 = vshll.u32 %v1805_v36, 16  ;;  %v2065_v8 = vld [vmem:[%s2133_s25 + $0x108] ss:$8 sps:$4 sm:$0xff]  }
  0x46   : > { %1940 = vmatmul.mubr.msk.bf16.vlgmr.msra.gmra.mrb[0].mxu0 %vm212_vm1, %v2057_v35  ;;  %v1399_v1 = vrot.slane %v1398_v25, 4  ;;  %v1423_v35 = vshll.u32 %v1803_v21, 16  ;;  %v1417_v37 = vrot.slane %v1415_v30, 5  ;;  %v1422_v38 = vrot.slane %v1420_v31, 4  ;;  %v1818_v18 = vld [vmem:[%s2375_s2] ss:$0 sm:$0xff] }
  0x47   : > { %1948 = vmatpush3.bf16.msra.mxu0 %v1488_v34  ;;  %1943 = vmatprep.mubr.msk.bf16.mxu0 %vm212_vm1, %v2060_v39  ;;  %v1411_v34 = vrot.slane %v1409_v27, 5  ;;  %v1429_v39 = vshll.u32 %v1804_v22, 16  ;;  %v1443_v49 = vshll.u32 %v1806_v16, 16  ;;  %v1436_v51 = vrot.slane %v1434_v23, 4 }
  0x48   : > { %v1404_v40 = vsel %vm2173_vm4, %v1399_v1, %v1403_v14  ;;  %v1425_v42 = vrot.slane %v1423_v35, 5  ;;  %v1451_v54 = vshll.u32 %v1807_v43, 16  ;;  %v1457_v55 = vshll.u32 %v1808_v45, 16 }
  0x49   : > { %v1412_v41 = vor.u32 %v1411_v34, %v1408_v33  ;;  %v1431_v47 = vrot.slane %v1429_v39, 5  ;;  %v1445_v60 = vrot.slane %v1443_v49, 5 }
  0x4a   : > { %1900 = vmatmul.mubr.msk.bf16.vlgmr.msra.gmra.mrb[0].mxu1 %vm212_vm1, %v2059_v52  ;;  %v1426_v50 = vor.u32 %v1425_v42, %v1422_v38  ;;  %v1448_v52 = vshrl.u32 %v1807_v43, 16  ;;  %v1453_v61 = vrot.slane %v1451_v54, 5  ;;  %v1459_v4 = vrot.slane %v1457_v55, 5 }
  0x4b   : > { %1958 = vmatpush3.bf16.msra.mxu1 %v2116_v3  ;;  %1903 = vmatprep.mubr.msk.bf16.mxu1 %vm212_vm1, %v2062_v5  ;;  %v1390_v3 = vsel %vm2173_vm4, %v1385_v29, %v1389_v9  ;;  %v1413_v10 = vrot.slane %v1412_v41, 4 }
  0x4c   : > { %v1811_v46 = vcombine.low %v1390_v3, %v1404_v40  ;;  %v1427_v57 = vrot.slane %v1426_v50, 4  ;;  %v1450_v58 = vrot.slane %v1448_v52, 4 }
  0x4d   : > { %v1418_v56 = vsel %vm2173_vm4, %v1413_v10, %v1417_v37 }
  0x4e   : > { %1944 = vmatmul.mubr.msk.bf16.gmra.mrb[4].mxu0 %vm212_vm1, %v2061_v53  ;;  %v1439_v53 = vrot.slane %v1437_v48, 5  ;;  %v1432_v62 = vsel %vm2173_vm4, %v1427_v57, %v1431_v47  ;;  %v1454_v2 = vor.u32 %v1453_v61, %v1450_v58 }
  0x4f   : > { %1949 = vmatprep.mubr.msk.bf16.mxu0 %vm212_vm1, %v1810_v28  ;;  %v1812_v63 = vcombine.low %v1418_v56, %v1432_v62 }
  0x50   : > { %v1440_v59 = vor.u32 %v1439_v53, %v1436_v51  ;;  %v1455_v6 = vrot.slane %v1454_v2, 4 }
  0x52   : > { %1904 = vmatmul.mubr.msk.bf16.gmra.mrb[4].mxu1 %vm212_vm1, %v2063_v32  ;;  %v1441_v0 = vrot.slane %v1440_v59, 4  ;;  %v1460_v7 = vsel %vm2173_vm4, %v1455_v6, %v1459_v4 }
  0x53   : > { %1913 = vmatprep.mubr.msk.bf16.mxu1 %vm212_vm1, %v2064_v15 }
  0x54   : > { %v1446_v5 = vsel %vm2173_vm4, %v1441_v0, %v1445_v60 }
  0x55   : > { %v1813_v9 = vcombine.low %v1446_v5, %v1460_v7 }
  0x56   : > { %1950 = vmatmul.mubr.msk.bf16.vlgmr.msra.gmra.mrb[0].mxu0 %vm212_vm1, %v1811_v46 }
  0x57   : > { %1953 = vmatprep.mubr.msk.bf16.mxu0 %vm212_vm1, %v1812_v63 }
  0x5e   : > { %1954 = vmatmul.mubr.msk.bf16.gmra.mrb[4].mxu0 %vm212_vm1, %v1813_v9  ;;  %1914 = vmatmul.mubr.msk.bf16.vlgmr.msra.gmra.mrb[4].mxu1 %vm212_vm1, %v2065_v8 }
 0x11d   : > { %v1901_v11 = vpop.f32.mrb[0].mxu1 }
 0x11e   : > { %v707_v12 = vpop.f32.mrb[1].mxu1 }
 0x11f   : > { %v1902_v13 = vpop.f32.mrb[2].mxu1 }
 0x120   : > { %v710_v14 = vpop.f32.mrb[3].mxu1 }
 0x129   : > { %v1951_v17 = vpop.f32.mrb[0].mxu0 }
 0x12a   : > { %v1959_v19 = vadd.f32 %v1951_v17, %v1901_v11  ;;  %v1524_v20 = vpop.f32.mrb[1].mxu0 }
 0x12b   : > { %v1960_v44 = vadd.f32 %v1524_v20, %v707_v12  ;;  %v1952_v21 = vpop.f32.mrb[2].mxu0 }
 0x12c   : > { %v1572_v22 = vadd.f32 %v1959_v19, %v1818_v18  ;;  %v1961_v24 = vadd.f32 %v1952_v21, %v1902_v13  ;;  %v1527_v25 = vpop.f32.mrb[3].mxu0 }
 0x12d   : > { %v1570_v26 = vadd.f32 %v1960_v44, %v1818_v18  ;;  %v1962_v27 = vadd.f32 %v1527_v25, %v710_v14 }
 0x12e   : > { %v1580_v28 = vmax.f32 %v1572_v22, 0.0  ;;  %v1573_v29 = vadd.f32 %v1961_v24, %v1818_v18 }
 0x12f   : > { %v1578_v30 = vmax.f32 %v1570_v26, 0.0  ;;  %v1571_v31 = vadd.f32 %v1962_v27, %v1818_v18 }
 0x130   : > { %v1588_v32 = vpack.c.bf16 %v1580_v28, %v1580_v28  ;;  %v1581_v1 = vmax.f32 %v1573_v29, 0.0 }
 0x131   : > { %v1586_v33 = vpack.c.bf16 %v1578_v30, %v1578_v30  ;;  %v1579_v34 = vmax.f32 %v1571_v31, 0.0  ;;  %v1955_v3 = vpop.f32.mrb[4].mxu0  ;;  %v1915_v38 = vpop.f32.mrb[4].mxu1 }
 0x132   : > { %1597 = vst.msk [vmem:[%s2352_s16 + $0x8] sm:$0xf] %vm1594_vm5, %v1588_v32  ;;  %v1589_v35 = vpack.c.bf16 %v1581_v1, %v1581_v1  ;;  %v1540_v37 = vpop.f32.mrb[5].mxu0  ;;  %v1963_v16 = vadd.f32 %v1955_v3, %v1915_v38  ;;  %v842_v40 = vpop.f32.mrb[5].mxu1 }
 0x133   : > { %1595 = vst.msk [vmem:[%s2352_s16] sm:$0xf] %vm1594_vm5, %v1586_v33  ;;  %v1587_v36 = vpack.c.bf16 %v1579_v34, %v1579_v34  ;;  %v1956_v39 = vpop.f32.mrb[6].mxu0  ;;  %v1964_v42 = vadd.f32 %v1540_v37, %v842_v40  ;;  %v1916_v43 = vpop.f32.mrb[6].mxu1 }
 0x134   : > { %1598 = vst.msk [vmem:[%s2352_s16 + $0xc] sm:$0xf] %vm1594_vm5, %v1589_v35  ;;  %v1543_v41 = vpop.f32.mrb[7].mxu0  ;;  %v1576_v45 = vadd.f32 %v1963_v16, %v1818_v18  ;;  %v1965_v23 = vadd.f32 %v1956_v39, %v1916_v43  ;;  %v845_v46 = vpop.f32.mrb[7].mxu1 }
 0x135   : > { %1596 = vst.msk [vmem:[%s2352_s16 + $0x4] sm:$0xf] %vm1594_vm5, %v1587_v36  ;;  %v1574_v15 = vadd.f32 %v1964_v42, %v1818_v18  ;;  %v1966_v47 = vadd.f32 %v1543_v41, %v845_v46 }
 0x136   : > { %v1584_v48 = vmax.f32 %v1576_v45, 0.0  ;;  %v1577_v49 = vadd.f32 %v1965_v23, %v1818_v18 }
 0x137   : > { %v1582_v10 = vmax.f32 %v1574_v15, 0.0  ;;  %v1575_v50 = vadd.f32 %v1966_v47, %v1818_v18 }
 0x138   : > { %v1592_v51 = vpack.c.bf16 %v1584_v48, %v1584_v48  ;;  %v1585_v52 = vmax.f32 %v1577_v49, 0.0 }
 0x139   : > { %v1590_v53 = vpack.c.bf16 %v1582_v10, %v1582_v10  ;;  %v1583_v54 = vmax.f32 %v1575_v50, 0.0 }
 0x13a   : > { %1601 = vst.msk [vmem:[%s2352_s16 + $0x18] sm:$0xf] %vm1594_vm5, %v1592_v51  ;;  %v1593_v55 = vpack.c.bf16 %v1585_v52, %v1585_v52 }
 0x13b   : > { %1599 = vst.msk [vmem:[%s2352_s16 + $0x10] sm:$0xf] %vm1594_vm5, %v1590_v53  ;;  %v1591_v56 = vpack.c.bf16 %v1583_v54, %v1583_v54 }
 0x13c   : > { %1602 = vst.msk [vmem:[%s2352_s16 + $0x1c] sm:$0xf] %vm1594_vm5, %v1593_v55 }
 0x13d   : > { %1600 = vst.msk [vmem:[%s2352_s16 + $0x14] sm:$0xf] %vm1594_vm5, %v1591_v56 }
 0x13e PF: > { %s13_s12 = sadd.s32 1, %s2072_s12  }
 0x13f   : > { %p10_p4 = scmp.ge.s32.totalorder %s13_s12, 4  }
 0x141   :  { %12 = sbr.rel (!%p10_p4) target bundleno = 1 (0x1), region = 75 }

</bundles_post_ra>
